<compile_context>
chip_gen: v7x
topology: tpu7x:2x2x1
jax: 0.10.0
libtpu: 0.0.40
codegen_flags: <defaults>
</compile_context>

<pallas_src>
import functools
import math

import jax
import jax.numpy as jnp
from jax.experimental import pallas as pl
from jax.experimental.pallas import tpu as pltpu


def linear_projector_kernel(dense_ref, w_ref, b_ref,
                            cat_idx_ref, ids_ref, len_ref,
                            out_ref, *, d_in, n_cat, k_pad):
    tb = dense_ref.shape[0]

    # Lane index over the fused contraction dimension.
    lane = jax.lax.broadcasted_iota(jnp.int32, (tb, k_pad), 1)

    # --- category one-hot at lane offset d_in (selects cat_emb row) ---------
    cat_mask = (lane == cat_idx_ref[...] + d_in).astype(jnp.bfloat16)

    # --- bag-of-words token counts at lane offset d_in + n_cat --------------
    ids = ids_ref[...]                                   # [tb, L] int32
    counts = jnp.zeros((tb, k_pad), jnp.float32)
    for l in range(ids.shape[1]):                        # L is small & static;
        counts = counts + (                              # intermediates are only
            lane == ids[:, l:l + 1] + (d_in + n_cat)     # [tb, k_pad] = 1 tile wide
        ).astype(jnp.float32)

    # (counts @ E) / len == (counts / len) @ E  -> scale before the fused matmul.
    inv_len = pl.reciprocal(len_ref[...], approx=True)   # [tb, 1] f32, EUP slot
    bow_mask = (counts * inv_len).astype(jnp.bfloat16)

    # --- fused activation: dense | one-hot(cat) | counts/len | 0-pad --------
    # dense_ref already carries the dense feature in lanes [0, d_in) and zeros
    # elsewhere; the mask lanes are disjoint, so a plain add assembles it.
    act = dense_ref[...] + cat_mask + bow_mask           # [tb, k_pad] bf16

    # --- single MXU push, f32 accumulation -----------------------------------
    out = jnp.dot(act, w_ref[...], preferred_element_type=jnp.float32)
    out_ref[...] = out + b_ref[...]                      # + [1, H] bias


def linear_projector(dense, w_t, b, cat_idx, cat_emb,
                     text_ids, text_len, text_emb, *, tile_b=128):
    B, D_IN = dense.shape
    H = w_t.shape[1]
    C = cat_emb.shape[0]
    V = text_emb.shape[0]
    L = text_ids.shape[1]

    if B < tile_b:
        tile_b = max(8, B)
    assert B % tile_b == 0 and tile_b % 8 == 0, "batch must tile by a multiple of 8"

    K = D_IN + C + V
    K_pad = max(128, ((K + 127) // 128) * 128)           # lane-aligned fused K

    # Fused weight: [ W_linear^T ; cat_emb ; text_emb ; zero pad ]  -> [K_pad, H]
    w_stacked = jnp.concatenate(
        [w_t.astype(jnp.float32),
         cat_emb.astype(jnp.float32),
         text_emb.astype(jnp.float32),
         jnp.zeros((K_pad - K, H), jnp.float32)],
        axis=0).astype(jnp.bfloat16)

    # Dense feature in fused-activation lanes [0, D_IN), zeros elsewhere.
    dense_padded = jnp.pad(dense.astype(jnp.float32),
                           ((0, 0), (0, K_pad - D_IN))).astype(jnp.bfloat16)

    args = (
        dense_padded,                                    # [B, K_pad] bf16
        w_stacked,                                       # [K_pad, H] bf16
        b.reshape(1, H).astype(jnp.float32),             # [1, H]    f32
        cat_idx.reshape(B, 1).astype(jnp.int32),         # [B, 1]    i32
        text_ids.astype(jnp.int32),                      # [B, L]    i32
        text_len.reshape(B, 1).astype(jnp.float32),      # [B, 1]    f32
    )

    kernel = functools.partial(linear_projector_kernel,
                               d_in=D_IN, n_cat=C, k_pad=K_pad)

    grid = (B // tile_b,)
    in_specs = [
        pl.BlockSpec((tile_b, K_pad), lambda i: (i, 0)),  # dense (per-row)
        pl.BlockSpec((K_pad, H),      lambda i: (0, 0)),  # fused weight (resident)
        pl.BlockSpec((1, H),          lambda i: (0, 0)),  # bias (resident)
        pl.BlockSpec((tile_b, 1),     lambda i: (i, 0)),  # category ids
        pl.BlockSpec((tile_b, L),     lambda i: (i, 0)),  # text token ids
        pl.BlockSpec((tile_b, 1),     lambda i: (i, 0)),  # text lengths
    ]
    out_specs = pl.BlockSpec((tile_b, H), lambda i: (i, 0))

    return pl.pallas_call(
        kernel,
        out_shape=jax.ShapeDtypeStruct((B, H), jnp.float32),
        grid=grid,
        in_specs=in_specs,
        out_specs=out_specs,
        compiler_params=pltpu.CompilerParams(
            dimension_semantics=("parallel",)),           # v7x: shard over both TCs
    )(*args)


if __name__ == "__main__":
    # Small synthetic shapes consistent with the module's forward.
    B, D_IN, H = 256, 16, 32     # batch (2 tiles of 128), dense-feature dim, hidden_dims
    C = 16                       # categorical cardinality (data.max() + 2)
    V = 64                       # text vocab size
    L = 8                        # tokens per text field
    TILE_B = 128

    key = jax.random.PRNGKey(0)
    ks = jax.random.split(key, 7)

    # --- deterministic inputs (the `ndata` dict) -----------------------------
    dense = jax.random.normal(ks[0], (B, D_IN), jnp.float32)
    cat_idx = jax.random.randint(ks[1], (B,), 0, C, jnp.int32)
    text_ids = jax.random.randint(ks[2], (B, L), 0, V, jnp.int32)
    text_len = jax.random.randint(ks[3], (B,), 1, L + 1, jnp.int32)  # "title__len"

    # --- deterministic parameters (xavier_uniform_ like __init__; bias = 0) --
    def xavier_uniform(k, shape):
        fan_out, fan_in = shape[0], shape[1]
        bound = math.sqrt(6.0 / (fan_in + fan_out))
        return jax.random.uniform(k, shape, jnp.float32, -bound, bound)

    w_pt = xavier_uniform(ks[4], (H, D_IN))   # PyTorch nn.Linear weight [out, in]
    w_t = w_pt.T                              # kernel layout [D_IN, H]
    b = jnp.zeros((H,), jnp.float32)          # nn.init.constant_(bias, 0)
    cat_emb = xavier_uniform(ks[5], (C, H))   # nn.Embedding(C, H)
    text_emb = xavier_uniform(ks[6], (V, H))  # BagOfWords embedding

    out = linear_projector(dense, w_t, b, cat_idx, cat_emb,
                           text_ids, text_len, text_emb, tile_b=TILE_B)
    out = jax.block_until_ready(out)

    # Pure-JAX full-precision reference for correctness (kernel uses bf16 MXU
    # inputs with f32 accumulation + approx reciprocal, hence the tolerance).
    ref = (dense @ w_t + b) \
        + cat_emb[cat_idx] \
        + text_emb[text_ids].sum(axis=1) / text_len[:, None].astype(jnp.float32)

    assert out.shape == (B, H) and out.dtype == jnp.float32
    max_err = float(jnp.max(jnp.abs(out - ref)))
    assert jnp.allclose(out, ref, atol=8e-2, rtol=5e-2), \
        f"mismatch vs reference (max abs err={max_err})"

    print("KERNEL_OK")
</pallas_src>

<mosaic_0001>
module attributes {stable_mosaic.version = 11 : i64} {
  func.func @linear_projector_kernel(%arg0: i32, %arg1: memref<128x128xbf16, #tpu.memory_space<vmem>>, %arg2: memref<128x32xbf16, #tpu.memory_space<vmem>>, %arg3: memref<1x32xf32, #tpu.memory_space<vmem>>, %arg4: memref<128x1xi32, #tpu.memory_space<vmem>>, %arg5: memref<128x8xi32, #tpu.memory_space<vmem>>, %arg6: memref<128x1xf32, #tpu.memory_space<vmem>>, %arg7: memref<128x32xf32, #tpu.memory_space<vmem>>) attributes {dimension_semantics = [#tpu.dimension_semantics<parallel>], iteration_bounds = array<i64: 2>, scalar_prefetch = 0 : i64, scratch_operands = 0 : i64, tpu.core_type = #tpu.core_type<tc>, window_params = [{transform_indices = @transform_0, window_bounds = array<i64: 128, 128>}, {pipeline_mode = #tpu.pipeline_mode<synchronous>, transform_indices = @transform_1, window_bounds = array<i64: 128, 32>}, {pipeline_mode = #tpu.pipeline_mode<synchronous>, transform_indices = @transform_2, window_bounds = array<i64: 1, 32>}, {transform_indices = @transform_3, window_bounds = array<i64: 128, 1>}, {transform_indices = @transform_4, window_bounds = array<i64: 128, 8>}, {transform_indices = @transform_5, window_bounds = array<i64: 128, 1>}, {transform_indices = @transform_6, window_bounds = array<i64: 128, 32>}]} {
    %0 = tpu.iota {dimensions = array<i32: 1>} : vector<128x128xi32>
    %c0 = arith.constant 0 : index
    %c0_0 = arith.constant 0 : index
    %1 = vector.load %arg4[%c0, %c0_0] : memref<128x1xi32, #tpu.memory_space<vmem>>, vector<128x1xi32>
    %c16_i32 = arith.constant 16 : i32
    %2 = vector.broadcast %c16_i32 : i32 to vector<128x1xi32>
    %3 = arith.addi %1, %2 : vector<128x1xi32>
    %4 = vector.broadcast %3 : vector<128x1xi32> to vector<128x128xi32>
    %5 = arith.cmpi eq, %0, %4 : vector<128x128xi32>
    %6 = arith.extui %5 : vector<128x128xi1> to vector<128x128xi32>
    %7 = arith.sitofp %6 : vector<128x128xi32> to vector<128x128xf32>
    %8 = arith.truncf %7 : vector<128x128xf32> to vector<128x128xbf16>
    %c0_1 = arith.constant 0 : index
    %c0_2 = arith.constant 0 : index
    %9 = vector.load %arg5[%c0_1, %c0_2] : memref<128x8xi32, #tpu.memory_space<vmem>>, vector<128x8xi32>
    %cst = arith.constant 0.000000e+00 : f32
    %10 = vector.broadcast %cst : f32 to vector<128x128xf32>
    %11 = vector.extract_strided_slice %9 {offsets = [0, 0], sizes = [128, 1], strides = [1, 1]} : vector<128x8xi32> to vector<128x1xi32>
    %c32_i32 = arith.constant 32 : i32
    %12 = vector.broadcast %c32_i32 : i32 to vector<128x1xi32>
    %13 = arith.addi %11, %12 : vector<128x1xi32>
    %14 = vector.broadcast %13 : vector<128x1xi32> to vector<128x128xi32>
    %15 = arith.cmpi eq, %0, %14 : vector<128x128xi32>
    %16 = arith.extui %15 : vector<128x128xi1> to vector<128x128xi32>
    %17 = arith.sitofp %16 : vector<128x128xi32> to vector<128x128xf32>
    %18 = arith.addf %10, %17 : vector<128x128xf32>
    %19 = vector.extract_strided_slice %9 {offsets = [0, 1], sizes = [128, 1], strides = [1, 1]} : vector<128x8xi32> to vector<128x1xi32>
    %c32_i32_3 = arith.constant 32 : i32
    %20 = vector.broadcast %c32_i32_3 : i32 to vector<128x1xi32>
    %21 = arith.addi %19, %20 : vector<128x1xi32>
    %22 = vector.broadcast %21 : vector<128x1xi32> to vector<128x128xi32>
    %23 = arith.cmpi eq, %0, %22 : vector<128x128xi32>
    %24 = arith.extui %23 : vector<128x128xi1> to vector<128x128xi32>
    %25 = arith.sitofp %24 : vector<128x128xi32> to vector<128x128xf32>
    %26 = arith.addf %18, %25 : vector<128x128xf32>
    %27 = vector.extract_strided_slice %9 {offsets = [0, 2], sizes = [128, 1], strides = [1, 1]} : vector<128x8xi32> to vector<128x1xi32>
    %c32_i32_4 = arith.constant 32 : i32
    %28 = vector.broadcast %c32_i32_4 : i32 to vector<128x1xi32>
    %29 = arith.addi %27, %28 : vector<128x1xi32>
    %30 = vector.broadcast %29 : vector<128x1xi32> to vector<128x128xi32>
    %31 = arith.cmpi eq, %0, %30 : vector<128x128xi32>
    %32 = arith.extui %31 : vector<128x128xi1> to vector<128x128xi32>
    %33 = arith.sitofp %32 : vector<128x128xi32> to vector<128x128xf32>
    %34 = arith.addf %26, %33 : vector<128x128xf32>
    %35 = vector.extract_strided_slice %9 {offsets = [0, 3], sizes = [128, 1], strides = [1, 1]} : vector<128x8xi32> to vector<128x1xi32>
    %c32_i32_5 = arith.constant 32 : i32
    %36 = vector.broadcast %c32_i32_5 : i32 to vector<128x1xi32>
    %37 = arith.addi %35, %36 : vector<128x1xi32>
    %38 = vector.broadcast %37 : vector<128x1xi32> to vector<128x128xi32>
    %39 = arith.cmpi eq, %0, %38 : vector<128x128xi32>
    %40 = arith.extui %39 : vector<128x128xi1> to vector<128x128xi32>
    %41 = arith.sitofp %40 : vector<128x128xi32> to vector<128x128xf32>
    %42 = arith.addf %34, %41 : vector<128x128xf32>
    %43 = vector.extract_strided_slice %9 {offsets = [0, 4], sizes = [128, 1], strides = [1, 1]} : vector<128x8xi32> to vector<128x1xi32>
    %c32_i32_6 = arith.constant 32 : i32
    %44 = vector.broadcast %c32_i32_6 : i32 to vector<128x1xi32>
    %45 = arith.addi %43, %44 : vector<128x1xi32>
    %46 = vector.broadcast %45 : vector<128x1xi32> to vector<128x128xi32>
    %47 = arith.cmpi eq, %0, %46 : vector<128x128xi32>
    %48 = arith.extui %47 : vector<128x128xi1> to vector<128x128xi32>
    %49 = arith.sitofp %48 : vector<128x128xi32> to vector<128x128xf32>
    %50 = arith.addf %42, %49 : vector<128x128xf32>
    %51 = vector.extract_strided_slice %9 {offsets = [0, 5], sizes = [128, 1], strides = [1, 1]} : vector<128x8xi32> to vector<128x1xi32>
    %c32_i32_7 = arith.constant 32 : i32
    %52 = vector.broadcast %c32_i32_7 : i32 to vector<128x1xi32>
    %53 = arith.addi %51, %52 : vector<128x1xi32>
    %54 = vector.broadcast %53 : vector<128x1xi32> to vector<128x128xi32>
    %55 = arith.cmpi eq, %0, %54 : vector<128x128xi32>
    %56 = arith.extui %55 : vector<128x128xi1> to vector<128x128xi32>
    %57 = arith.sitofp %56 : vector<128x128xi32> to vector<128x128xf32>
    %58 = arith.addf %50, %57 : vector<128x128xf32>
    %59 = vector.extract_strided_slice %9 {offsets = [0, 6], sizes = [128, 1], strides = [1, 1]} : vector<128x8xi32> to vector<128x1xi32>
    %c32_i32_8 = arith.constant 32 : i32
    %60 = vector.broadcast %c32_i32_8 : i32 to vector<128x1xi32>
    %61 = arith.addi %59, %60 : vector<128x1xi32>
    %62 = vector.broadcast %61 : vector<128x1xi32> to vector<128x128xi32>
    %63 = arith.cmpi eq, %0, %62 : vector<128x128xi32>
    %64 = arith.extui %63 : vector<128x128xi1> to vector<128x128xi32>
    %65 = arith.sitofp %64 : vector<128x128xi32> to vector<128x128xf32>
    %66 = arith.addf %58, %65 : vector<128x128xf32>
    %67 = vector.extract_strided_slice %9 {offsets = [0, 7], sizes = [128, 1], strides = [1, 1]} : vector<128x8xi32> to vector<128x1xi32>
    %c32_i32_9 = arith.constant 32 : i32
    %68 = vector.broadcast %c32_i32_9 : i32 to vector<128x1xi32>
    %69 = arith.addi %67, %68 : vector<128x1xi32>
    %70 = vector.broadcast %69 : vector<128x1xi32> to vector<128x128xi32>
    %71 = arith.cmpi eq, %0, %70 : vector<128x128xi32>
    %72 = arith.extui %71 : vector<128x128xi1> to vector<128x128xi32>
    %73 = arith.sitofp %72 : vector<128x128xi32> to vector<128x128xf32>
    %74 = arith.addf %66, %73 : vector<128x128xf32>
    %c0_10 = arith.constant 0 : index
    %c0_11 = arith.constant 0 : index
    %75 = vector.load %arg6[%c0_10, %c0_11] : memref<128x1xf32, #tpu.memory_space<vmem>>, vector<128x1xf32>
    %76 = tpu.reciprocal %75 {approx = true} : vector<128x1xf32> -> vector<128x1xf32>
    %77 = vector.broadcast %76 : vector<128x1xf32> to vector<128x128xf32>
    %78 = arith.mulf %74, %77 : vector<128x128xf32>
    %79 = arith.truncf %78 : vector<128x128xf32> to vector<128x128xbf16>
    %c0_12 = arith.constant 0 : index
    %c0_13 = arith.constant 0 : index
    %80 = vector.load %arg1[%c0_12, %c0_13] : memref<128x128xbf16, #tpu.memory_space<vmem>>, vector<128x128xbf16>
    %81 = arith.addf %80, %8 : vector<128x128xbf16>
    %82 = arith.addf %81, %79 : vector<128x128xbf16>
    %c0_14 = arith.constant 0 : index
    %c0_15 = arith.constant 0 : index
    %83 = vector.load %arg2[%c0_14, %c0_15] : memref<128x32xbf16, #tpu.memory_space<vmem>>, vector<128x32xbf16>
    %cst_16 = arith.constant dense<0.000000e+00> : vector<128x32xf32>
    %84 = tpu.matmul %82, %83, %cst_16 {dimension_numbers = #tpu.dot_dimension_numbers<[1], [0], [0], [1], [0, 0, 1, 1], [], []>} : vector<128x128xbf16>, vector<128x32xbf16>, vector<128x32xf32> -> vector<128x32xf32>
    %c0_17 = arith.constant 0 : index
    %c0_18 = arith.constant 0 : index
    %85 = vector.load %arg3[%c0_17, %c0_18] : memref<1x32xf32, #tpu.memory_space<vmem>>, vector<1x32xf32>
    %86 = vector.broadcast %85 : vector<1x32xf32> to vector<128x32xf32>
    %87 = arith.addf %84, %86 : vector<128x32xf32>
    %c0_19 = arith.constant 0 : index
    %c0_20 = arith.constant 0 : index
    %88 = vector.load %arg7[%c0_19, %c0_20] : memref<128x32xf32, #tpu.memory_space<vmem>>, vector<128x32xf32>
    tpu.vector_store %arg7[%c0_19, %c0_20], %87 {strides = array<i32>} : memref<128x32xf32, #tpu.memory_space<vmem>>, vector<128x32xf32>,
    return
  }
  func.func @transform_0(%arg0: i32) -> (i32, i32) {
    %c0_i32 = arith.constant 0 : i32
    %c0_i32_0 = arith.constant 0 : i32
    return %arg0, %c0_i32 : i32, i32
  }
  func.func @transform_1(%arg0: i32) -> (i32, i32) {
    %c0_i32 = arith.constant 0 : i32
    %c0_i32_0 = arith.constant 0 : i32
    %c0_i32_1 = arith.constant 0 : i32
    return %c0_i32, %c0_i32_0 : i32, i32
  }
  func.func @transform_2(%arg0: i32) -> (i32, i32) {
    %c0_i32 = arith.constant 0 : i32
    %c0_i32_0 = arith.constant 0 : i32
    %c0_i32_1 = arith.constant 0 : i32
    return %c0_i32, %c0_i32_0 : i32, i32
  }
  func.func @transform_3(%arg0: i32) -> (i32, i32) {
    %c0_i32 = arith.constant 0 : i32
    %c0_i32_0 = arith.constant 0 : i32
    return %arg0, %c0_i32 : i32, i32
  }
  func.func @transform_4(%arg0: i32) -> (i32, i32) {
    %c0_i32 = arith.constant 0 : i32
    %c0_i32_0 = arith.constant 0 : i32
    return %arg0, %c0_i32 : i32, i32
  }
  func.func @transform_5(%arg0: i32) -> (i32, i32) {
    %c0_i32 = arith.constant 0 : i32
    %c0_i32_0 = arith.constant 0 : i32
    return %arg0, %c0_i32 : i32, i32
  }
  func.func @transform_6(%arg0: i32) -> (i32, i32) {
    %c0_i32 = arith.constant 0 : i32
    %c0_i32_0 = arith.constant 0 : i32
    return %arg0, %c0_i32 : i32, i32
  }
}

</mosaic_0001>

<bundles_post_ra>
// kernel: tpu_custom_call.1
= control target key start
LH: loop header
LB: loop body
LE: loop exit
PB: predicated region body
PF: predicated region fallthrough
CT: control target
= control target key end

     0   :  { %s2448_s21 = smov 0   ;;  %s3656_s0 = inlined_call_operand.vmem [shape: bf16[256,128], index: 0, kind: input, shape index: {}]   ;;  %s3657_s1 = inlined_call_operand.vmem [shape: bf16[128,32], index: 1, kind: input, shape index: {}]   ;;  %s3658_s2 = inlined_call_operand.vmem [shape: f32[1,32], index: 2, kind: input, shape index: {}]   ;;  %s3659_s3 = inlined_call_operand.vmem [shape: s32[256,1], index: 3, kind: input, shape index: {}]   ;;  %s3660_s4 = inlined_call_operand.vmem [shape: s32[256,8], index: 4, kind: input, shape index: {}]   ;;  %s3661_s5 = inlined_call_operand.vmem [shape: f32[256,1], index: 5, kind: input, shape index: {}]   ;;  %s3662_s6 = inlined_call_operand.vmem [shape: f32[256,32], index: 6, kind: output, shape index: {}]  }
   0x1 LB: > { %s2009_s22 = sadd.s32 4294967295, %s2402_s21   ;;  %p2013_p0 = scmp.ge.s32.totalorder %s2402_s21, 1  ;;  %s2402_s21 = sphi %s2448_s21, %s16_s21  }
   0x2   : > { %p246_p1 = scmp.lt.s32.totalorder %s2402_s21, 3 }
   0x4   : > { %p247_p2 = pnand %p2013_p0, %p246_p1 }
   0x6   : > { %250 = sbr.rel (%p247_p2) target bundleno = 735 (0x2df), region = 44 }
   0xd   : > { %s2014_s23 = sshll.u32 %s2009_s22, 4  ;;  %v2404_v0 = vmov 1   ;;  %v3669_v1 = vmov 0   ;;  %v2406_v37 = vmov 2   ;;  %v2407_v49 = vmov 3  }
   0xe   : > { %2333 = vset.pattern.permute.xlu0 %v2404_v0  ;;  %2332 = vset.pattern.permute.xlu1 %v3669_v1  ;;  %p292_p3 = scmp.lt.s32.totalorder %s2014_s23, 31  ;;  %v3665_v52 = vmov 4   ;;  %v3663_v53 = vmov 5  }
  0x10   : > { %s3783_s23 = smov (!%p292_p3, %s2014_s23), 31 }
  0x11   : > { %s2461_s24 = sshll.u32 %s3783_s23, 3  ;;  %s2015_s29 = sshll.u32 %s3783_s23, 2 }
  0x12   : > { %s2467_s27 = scalar_lea.vmem %s3660_s4, %s2461_s24  ;;  %s2474_s30 = scalar_lea.vmem %s3659_s3, %s2461_s24 }
  0x13   : > { %v460_v2 = vld [vmem:[%s2467_s27] sm:$0xff]  ;;  %v463_v3 = vld [vmem:[%s2467_s27 + $0x18] sm:$0xff]  ;;  %v326_v5 = vld [vmem:[%s2474_s30 + $0x10] sm:$0xff]  ;;  %s2799_s9 = scalar_lea.vmem %s3661_s5, %s2461_s24  ;;  %s3400_s7 = scalar_lea.vmem %s3656_s0, %s2015_s29 }
  0x14   : > { %v2477_v4 = vadd.s32 32, %v460_v2  ;;  %v327_v6 = vld [vmem:[%s2474_s30 + $0x18] sm:$0xff]  ;;  %v342_v7 = vadd.s32 16, %v326_v5  ;;  %v2482_v8 = vadd.s32 32, %v463_v3  ;;  %v465_v10 = vld [vmem:[%s2467_s27 + $0x28] sm:$0xff]  ;;  %v464_v36 = vld [vmem:[%s2467_s27 + $0x20] sm:$0xff]  ;;  %s3619_s12 = scalar_lea.vmem %s3662_s6, %s2461_s24 }
  0x15   : > { %v343_v9 = vadd.s32 16, %v327_v6  ;;  %v329_v11 = vld [vmem:[%s2474_s30 + $0x28] sm:$0xff]  ;;  %v2487_v12 = vadd.s32 32, %v465_v10  ;;  %v467_v14 = vld [vmem:[%s2467_s27 + $0x38] sm:$0xff]  ;;  %v2521_v38 = vadd.s32 32, %v464_v36  ;;  %v466_v39 = vld [vmem:[%s2467_s27 + $0x30] sm:$0xff] }
  0x16   : > { %605 = vperm.xlu0 %2333, %v2477_v4   ;;  %363 = vperm.xlu1 %2332, %v342_v7   ;;  %v345_v13 = vadd.s32 16, %v329_v11  ;;  %v331_v15 = vld [vmem:[%s2474_s30 + $0x38] sm:$0xff]  ;;  %v2492_v16 = vadd.s32 32, %v467_v14  ;;  %v469_v18 = vld [vmem:[%s2467_s27 + $0x48] sm:$0xff]  ;;  %v2526_v40 = vadd.s32 32, %v466_v39  ;;  %v468_v41 = vld [vmem:[%s2467_s27 + $0x40] sm:$0xff] }
  0x17   : > { %v347_v17 = vadd.s32 16, %v331_v15  ;;  %v333_v19 = vld [vmem:[%s2474_s30 + $0x48] sm:$0xff]  ;;  %v2497_v20 = vadd.s32 32, %v469_v18  ;;  %v471_v22 = vld [vmem:[%s2467_s27 + $0x58] sm:$0xff]  ;;  %v2531_v42 = vadd.s32 32, %v468_v41  ;;  %v470_v43 = vld [vmem:[%s2467_s27 + $0x50] sm:$0xff] }
  0x18   : > { %v349_v21 = vadd.s32 16, %v333_v19  ;;  %v335_v23 = vld [vmem:[%s2474_s30 + $0x58] sm:$0xff]  ;;  %v2502_v24 = vadd.s32 32, %v471_v22  ;;  %v473_v26 = vld [vmem:[%s2467_s27 + $0x68] sm:$0xff]  ;;  %v2536_v44 = vadd.s32 32, %v470_v43  ;;  %v472_v45 = vld [vmem:[%s2467_s27 + $0x60] sm:$0xff] }
  0x19   : > { %v351_v25 = vadd.s32 16, %v335_v23  ;;  %v337_v27 = vld [vmem:[%s2474_s30 + $0x68] sm:$0xff]  ;;  %v2507_v28 = vadd.s32 32, %v473_v26  ;;  %v475_v30 = vld [vmem:[%s2467_s27 + $0x78] sm:$0xff]  ;;  %v2541_v46 = vadd.s32 32, %v472_v45  ;;  %v474_v47 = vld [vmem:[%s2467_s27 + $0x70] sm:$0xff] }
  0x1a   : > { %614 = vperm.xlu0 %2333, %v2482_v8   ;;  %366 = vperm.xlu1 %2332, %v343_v9   ;;  %v353_v29 = vadd.s32 16, %v337_v27  ;;  %v339_v31 = vld [vmem:[%s2474_s30 + $0x78] sm:$0xff]  ;;  %v2512_v32 = vadd.s32 32, %v475_v30  ;;  %v461_v34 = vld [vmem:[%s2467_s27 + $0x8] sm:$0xff]  ;;  %v2546_v48 = vadd.s32 32, %v474_v47  ;;  %v462_v50 = vld [vmem:[%s2467_s27 + $0x10] sm:$0xff] }
  0x1b   : > { %v355_v33 = vadd.s32 16, %v339_v31  ;;  %v2516_v35 = vadd.s32 32, %v461_v34  ;;  %v2556_v51 = vadd.s32 32, %v462_v50  ;;  %v3668_v6 = vmov 6   ;;  %v324_v43 = vld [vmem:[%s2474_s30] sm:$0xff]  ;;  %v325_v50 = vld [vmem:[%s2474_s30 + $0x8] sm:$0xff] }
  0x1c   : > { %v3666_v26 = vmov 7  }
  0x1e   : > { %620 = vperm.xlu0 %2333, %v2487_v12   ;;  %372 = vperm.xlu1 %2332, %v345_v13  }
  0x22   : > { %626 = vperm.xlu0 %2333, %v2492_v16   ;;  %378 = vperm.xlu1 %2332, %v347_v17  }
  0x26   : > { %632 = vperm.xlu0 %2333, %v2497_v20   ;;  %384 = vperm.xlu1 %2332, %v349_v21  }
  0x2a   : > { %638 = vperm.xlu0 %2333, %v2502_v24   ;;  %390 = vperm.xlu1 %2332, %v351_v25  }
  0x2e   : > { %644 = vperm.xlu0 %2333, %v2507_v28   ;;  %396 = vperm.xlu1 %2332, %v353_v29  }
  0x32   : > { %650 = vperm.xlu0 %2333, %v2512_v32   ;;  %402 = vperm.xlu1 %2332, %v355_v33  }
  0x36   : > { %2336 = vset.pattern.permute.xlu0 %v2406_v37  ;;  %496 = vperm.xlu1 %2332, %v2516_v35  }
  0x37   : > { %720 = vperm.xlu0 %2336, %v2516_v35  }
  0x3a   : > { %502 = vperm.xlu1 %2332, %v2482_v8  }
  0x3b   : > { %729 = vperm.xlu0 %2336, %v2521_v38  }
  0x3e   : > { %508 = vperm.xlu1 %2332, %v2487_v12  }
  0x3f   : > { %735 = vperm.xlu0 %2336, %v2526_v40  }
  0x42   : > { %514 = vperm.xlu1 %2332, %v2492_v16  }
  0x43   : > { %741 = vperm.xlu0 %2336, %v2531_v42  }
  0x46   : > { %520 = vperm.xlu1 %2332, %v2497_v20  }
  0x47   : > { %747 = vperm.xlu0 %2336, %v2536_v44  }
  0x4a   : > { %526 = vperm.xlu1 %2332, %v2502_v24  }
  0x4b   : > { %753 = vperm.xlu0 %2336, %v2541_v46  }
  0x4e   : > { %532 = vperm.xlu1 %2332, %v2507_v28  }
  0x4f   : > { %759 = vperm.xlu0 %2336, %v2546_v48  }
  0x52   : > { %538 = vperm.xlu1 %2332, %v2512_v32  }
  0x53   : > { %2337 = vset.pattern.permute.xlu0 %v2407_v49 }
  0x54   : > { %829 = vperm.xlu0 %2337, %v2477_v4  }
  0x56   : > { %2334 = vset.pattern.permute.xlu1 %v2404_v0 }
  0x57   : > { %608 = vperm.xlu1 %2334, %v2516_v35  }
  0x58   : > { %838 = vperm.xlu0 %2337, %v2482_v8  }
  0x5b   : > { %611 = vperm.xlu1 %2334, %v2556_v51  }
  0x5c   : > { %844 = vperm.xlu0 %2337, %v2487_v12  }
  0x5f   : > { %617 = vperm.xlu1 %2334, %v2521_v38  }
  0x60   : > { %850 = vperm.xlu0 %2337, %v2492_v16  }
  0x63   : > { %623 = vperm.xlu1 %2334, %v2526_v40  }
  0x64   : > { %856 = vperm.xlu0 %2337, %v2497_v20  }
  0x67   : > { %629 = vperm.xlu1 %2334, %v2531_v42  }
  0x68   : > { %862 = vperm.xlu0 %2337, %v2502_v24  }
  0x6b   : > { %635 = vperm.xlu1 %2334, %v2536_v44  }
  0x6c   : > { %868 = vperm.xlu0 %2337, %v2507_v28  }
  0x6f   : > { %641 = vperm.xlu1 %2334, %v2541_v46  }
  0x70   : > { %874 = vperm.xlu0 %2337, %v2512_v32  }
  0x73   : > { %647 = vperm.xlu1 %2334, %v2546_v48  }
  0x74   : > { %2340 = vset.pattern.permute.xlu0 %v3665_v52 }
  0x75   : > { %944 = vperm.xlu0 %2340, %v2516_v35  }
  0x77   : > { %2335 = vset.pattern.permute.xlu1 %v2406_v37 }
  0x78   : > { %717 = vperm.xlu1 %2335, %v2477_v4  }
  0x79   : > { %968 = vperm.xlu0 %2340, %v2497_v20  }
  0x7c   : > { %723 = vperm.xlu1 %2335, %v2556_v51  }
  0x7d   : > { %971 = vperm.xlu0 %2340, %v2536_v44  }
  0x80   : > { %726 = vperm.xlu1 %2335, %v2482_v8  }
  0x81   : > { %956 = vperm.xlu0 %2340, %v2487_v12  }
  0x84   : > { %732 = vperm.xlu1 %2335, %v2487_v12  }
  0x85   : > { %959 = vperm.xlu0 %2340, %v2526_v40  }
  0x88   : > { %738 = vperm.xlu1 %2335, %v2492_v16  }
  0x89   : > { %983 = vperm.xlu0 %2340, %v2546_v48  }
  0x8c   : > { %744 = vperm.xlu1 %2335, %v2497_v20  }
  0x8d   : > { %2345 = vset.pattern.permute.xlu0 %v3663_v53 }
  0x8e   : > { %1053 = vperm.xlu0 %2345, %v2477_v4  }
  0x90   : > { %750 = vperm.xlu1 %2335, %v2502_v24  }
  0x92   : > { %1080 = vperm.xlu0 %2345, %v2497_v20  }
  0x94   : > { %756 = vperm.xlu1 %2335, %v2507_v28  }
  0x95   : > { %v2589_v54 = vpop.permute.xlu0 %605  ;;  %v2591_v55 = vpop.permute.xlu1 %363 }
  0x96   : > { %3678 = vst [vmem:[#allocation2_spill] sm:$0xff] %v2591_v55  ;;  %1062 = vperm.xlu0 %2345, %v2482_v8  }
  0x98   : > { %762 = vperm.xlu1 %2335, %v2512_v32  }
  0x99   : > { %v2595_v56 = vpop.permute.xlu0 %614  ;;  %v2597_v57 = vpop.permute.xlu1 %366 }
  0x9a   : > { %3679 = vst [vmem:[#allocation3_spill] sm:$0xff] %v2597_v57  ;;  %1086 = vperm.xlu0 %2345, %v2502_v24  }
  0x9c   : > { %2338 = vset.pattern.permute.xlu1 %v2407_v49  ;;  %v340_v49 = vadd.s32 16, %v324_v43 }
  0x9d   : > { %v2600_v58 = vpop.permute.xlu0 %620  ;;  %832 = vperm.xlu1 %2338, %v2516_v35   ;;  %v2603_v59 = vpop.permute.xlu1 %372 }
  0x9e   : > { %3680 = vst [vmem:[#allocation4_spill] sm:$0xff] %v2603_v59  ;;  %1065 = vperm.xlu0 %2345, %v2521_v38  }
  0xa1   : > { %v2606_v60 = vpop.permute.xlu0 %626  ;;  %835 = vperm.xlu1 %2338, %v2556_v51   ;;  %v2609_v61 = vpop.permute.xlu1 %378 }
  0xa2   : > { %3681 = vst [vmem:[#allocation5_spill] sm:$0xff] %v2609_v61  ;;  %1092 = vperm.xlu0 %2345, %v2507_v28  }
  0xa5   : > { %v2612_v62 = vpop.permute.xlu0 %632  ;;  %841 = vperm.xlu1 %2338, %v2521_v38   ;;  %v2615_v63 = vpop.permute.xlu1 %384 }
  0xa6   : > { %3682 = vst [vmem:[#allocation6_spill] sm:$0xff] %v2615_v63  ;;  %1071 = vperm.xlu0 %2345, %v2526_v40  }
  0xa9   : > { %v2618_v0 = vpop.permute.xlu0 %638  ;;  %847 = vperm.xlu1 %2338, %v2526_v40   ;;  %v2621_v2 = vpop.permute.xlu1 %390 }
  0xaa   : > { %3683 = vst [vmem:[#allocation7_spill] sm:$0xff] %v2621_v2  ;;  %1098 = vperm.xlu0 %2345, %v2512_v32  }
  0xad   : > { %v2624_v3 = vpop.permute.xlu0 %644  ;;  %853 = vperm.xlu1 %2338, %v2531_v42   ;;  %v2627_v5 = vpop.permute.xlu1 %396 }
  0xae   : > { %3684 = vst [vmem:[#allocation8_spill] sm:$0xff] %v2627_v5  ;;  %2349 = vset.pattern.permute.xlu0 %v3668_v6  ;;  %v330_v5 = vld [vmem:[%s2474_s30 + $0x30] sm:$0xff] }
  0xaf   : > { %1168 = vperm.xlu0 %2349, %v2516_v35  }
  0xb1   : > { %v2631_v7 = vpop.permute.xlu0 %650  ;;  %859 = vperm.xlu1 %2338, %v2536_v44   ;;  %v2634_v9 = vpop.permute.xlu1 %402 }
  0xb2   : > { %3685 = vst [vmem:[#allocation9_spill] sm:$0xff] %v2634_v9  ;;  %v328_v9 = vld [vmem:[%s2474_s30 + $0x20] sm:$0xff] }
  0xb3   : > { %1171 = vperm.xlu0 %2349, %v2556_v51   ;;  %v344_v43 = vadd.s32 16, %v328_v9  ;;  %v334_v9 = vld [vmem:[%s2474_s30 + $0x50] sm:$0xff] }
  0xb5   : > { %865 = vperm.xlu1 %2338, %v2541_v46   ;;  %v2638_v10 = vpop.permute.xlu1 %496 }
  0xb6   : > { %v2640_v11 = vpop.permute.xlu0 %720 }
  0xb7   : > { %1195 = vperm.xlu0 %2349, %v2536_v44  }
  0xb9   : > { %871 = vperm.xlu1 %2338, %v2546_v48   ;;  %v2644_v13 = vpop.permute.xlu1 %502 }
  0xba   : > { %v2646_v14 = vpop.permute.xlu0 %729 }
  0xbb   : > { %1177 = vperm.xlu0 %2349, %v2521_v38  }
  0xbd   : > { %2339 = vset.pattern.permute.xlu1 %v3665_v52  ;;  %v2650_v15 = vpop.permute.xlu1 %508 }
  0xbe   : > { %v2652_v17 = vpop.permute.xlu0 %735  ;;  %941 = vperm.xlu1 %2339, %v2477_v4  }
  0xbf   : > { %1204 = vperm.xlu0 %2349, %v2507_v28  }
  0xc1   : > { %v2656_v18 = vpop.permute.xlu1 %514 }
  0xc2   : > { %v2658_v19 = vpop.permute.xlu0 %741  ;;  %947 = vperm.xlu1 %2339, %v2556_v51  }
  0xc3   : > { %1186 = vperm.xlu0 %2349, %v2492_v16  }
  0xc5   : > { %v2662_v21 = vpop.permute.xlu1 %520 }
  0xc6   : > { %v2664_v22 = vpop.permute.xlu0 %747  ;;  %965 = vperm.xlu1 %2339, %v2531_v42  }
  0xc7   : > { %1210 = vperm.xlu0 %2349, %v2512_v32  }
  0xc9   : > { %v2668_v23 = vpop.permute.xlu1 %526 }
  0xca   : > { %v2670_v25 = vpop.permute.xlu0 %753  ;;  %950 = vperm.xlu1 %2339, %v2482_v8  }
  0xcb   : > { %2352 = vset.pattern.permute.xlu0 %v3666_v26  ;;  %v341_v26 = vadd.s32 16, %v325_v50  ;;  %v332_v50 = vld [vmem:[%s2474_s30 + $0x40] sm:$0xff] }
  0xcc   : > { %1277 = vperm.xlu0 %2352, %v2477_v4  }
  0xcd   : > { %v2675_v27 = vpop.permute.xlu1 %532 }
  0xce   : > { %v2677_v29 = vpop.permute.xlu0 %759  ;;  %974 = vperm.xlu1 %2339, %v2502_v24  }
  0xd0   : > { %1304 = vperm.xlu0 %2352, %v2497_v20  }
  0xd1   : > { %v2681_v30 = vpop.permute.xlu1 %538 }
  0xd2   : > { %2341 = vset.pattern.permute.xlu1 %v3663_v53 }
  0xd3   : > { %v2684_v31 = vpop.permute.xlu0 %829  ;;  %1056 = vperm.xlu1 %2341, %v2516_v35  }
  0xd4   : > { %1286 = vperm.xlu0 %2352, %v2482_v8  }
  0xd6   : > { %v2688_v33 = vpop.permute.xlu1 %608 }
  0xd7   : > { %v2690_v34 = vpop.permute.xlu0 %838  ;;  %1077 = vperm.xlu1 %2341, %v2531_v42  }
  0xd8   : > { %1310 = vperm.xlu0 %2352, %v2502_v24  }
  0xda   : > { %v2694_v36 = vpop.permute.xlu1 %611 }
  0xdb   : > { %v2696_v37 = vpop.permute.xlu0 %844  ;;  %1059 = vperm.xlu1 %2341, %v2556_v51  }
  0xdc   : > { %1292 = vperm.xlu0 %2352, %v2487_v12  }
  0xde   : > { %v2700_v39 = vpop.permute.xlu1 %617 }
  0xdf   : > { %v2702_v41 = vpop.permute.xlu0 %850  ;;  %1083 = vperm.xlu1 %2341, %v2536_v44  }
  0xe0   : > { %3686 = vst [vmem:[#allocation10_spill] sm:$0xff] %v2702_v41  ;;  %1295 = vperm.xlu0 %2352, %v2526_v40   ;;  %v3691_v41 = vmov 7  }
  0xe2   : > { %v2707_v45 = vpop.permute.xlu1 %623 }
  0xe3   : > { %v2709_v47 = vpop.permute.xlu0 %856  ;;  %2342 = vset.pattern.permute.xlu1 %v3668_v6 }
  0xe4   : > { %1319 = vperm.xlu0 %2352, %v2546_v48   ;;  %1165 = vperm.xlu1 %2342, %v2477_v4  }
  0xe6   : > { %v2715_v53 = vpop.permute.xlu1 %629 }
  0xe7   : > { %v2717_v52 = vpop.permute.xlu0 %862 }
  0xe8   : > { %2354 = vset.pattern.permute.xlu0 %v3669_v1  ;;  %1189 = vperm.xlu1 %2342, %v2531_v42  }
  0xe9   : > { %357 = vperm.xlu0 %2354, %v340_v49   ;;  %v346_v49 = vadd.s32 16, %v330_v5  ;;  %v336_v5 = vld [vmem:[%s2474_s30 + $0x60] sm:$0xff] }
  0xea   : > { %v2722_v6 = vpop.permute.xlu1 %635 }
  0xeb   : > { %v2724_v61 = vpop.permute.xlu0 %868 }
  0xec   : > { %1192 = vperm.xlu1 %2342, %v2497_v20   ;;  %v348_v20 = vadd.s32 16, %v332_v50 }
  0xed   : > { %360 = vperm.xlu0 %2354, %v341_v26  }
  0xee   : > { %v2728_v59 = vpop.permute.xlu1 %641 }
  0xef   : > { %3687 = vst [vmem:[#allocation11_spill] sm:$0xff] %v2728_v59  ;;  %v2730_v2 = vpop.permute.xlu0 %874 }
  0xf0   : > { %3688 = vst [vmem:[#allocation12_spill] sm:$0xff] %v2730_v2  ;;  %1174 = vperm.xlu1 %2342, %v2482_v8   ;;  %v350_v8 = vadd.s32 16, %v334_v9  ;;  %v2357_v2 = vld [vmem:[%s3657_s1 + $0x8] sm:$0xff]  }
  0xf1   : > { %369 = vperm.xlu0 %2354, %v344_v43  }
  0xf2   : > { %v2734_v1 = vpop.permute.xlu1 %647 }
  0xf3   : > { %3689 = vst [vmem:[#allocation13_spill] sm:$0xff] %v2734_v1  ;;  %v322_v1 = vlaneseq }
  0xf4   : > { %v2736_v57 = vpop.permute.xlu0 %944  ;;  %1198 = vperm.xlu1 %2342, %v2502_v24   ;;  %v352_v24 = vadd.s32 16, %v336_v5 }
  0xf5   : > { %375 = vperm.xlu0 %2354, %v346_v49   ;;  %v338_v49 = vld [vmem:[%s2474_s30 + $0x70] sm:$0xff] }
  0xf7   : > { %v2740_v26 = vpop.permute.xlu1 %717 }
  0xf8   : > { %3690 = vst [vmem:[#allocation14_spill] sm:$0xff] %v2740_v26  ;;  %v969_v55 = vpop.permute.xlu0 %968  ;;  %2343 = vset.pattern.permute.xlu1 %v3691_v41 }
  0xf9   : > { %381 = vperm.xlu0 %2354, %v348_v20   ;;  %1280 = vperm.xlu1 %2343, %v2516_v35   ;;  %v354_v20 = vadd.s32 16, %v338_v49 }
  0xfb   : > { %v2745_v43 = vpop.permute.xlu1 %723 }
  0xfc   : > { %3692 = vst [vmem:[#allocation15_spill] sm:$0xff] %v2745_v43  ;;  %v2747_v63 = vpop.permute.xlu0 %971  ;;  %v2760_v43 = vand.u32 127, %v322_v1 }
  0xfd   : > { %3693 = vst [vmem:[#allocation16_spill] sm:$0xff] %v2747_v63  ;;  %387 = vperm.xlu0 %2354, %v350_v8   ;;  %1301 = vperm.xlu1 %2343, %v2531_v42  }
  0xfe   : > { %vm661_vm0 = vcmp.eq.s32.totalorder %v2760_v43, %v2612_v62  ;;  %vm549_vm1 = vcmp.eq.s32.totalorder %v2760_v43, %v2662_v21  ;;  %vm885_vm2 = vcmp.eq.s32.totalorder %v2760_v43, %v2709_v47  ;;  %vm997_vm3 = vcmp.eq.s32.totalorder %v2760_v43, %v969_v55 }
  0xff   : > { %v2751_v50 = vpop.permute.xlu1 %726  ;;  %vm655_vm6 = vcmp.eq.s32.totalorder %v2760_v43, %v2595_v56  ;;  %vm543_vm7 = vcmp.eq.s32.totalorder %v2760_v43, %v2644_v13  ;;  %vm663_vm9 = vcmp.eq.s32.totalorder %v2760_v43, %v2618_v0  ;;  %vm551_vm10 = vcmp.eq.s32.totalorder %v2760_v43, %v2668_v23 }
 0x100   : > { %v2753_v26 = vpop.permute.xlu0 %956  ;;  %vm767_vm8 = vcmp.eq.s32.totalorder %v2760_v43, %v2751_v50  ;;  %vm653_vm11 = vcmp.eq.s32.totalorder %v2760_v43, %v2688_v33  ;;  %vm879_vm12 = vcmp.eq.s32.totalorder %v2760_v43, %v2690_v34  ;;  %vm541_vm14 = vcmp.eq.s32.totalorder %v2760_v43, %v2638_v10 }
 0x101   : > { %3694 = vst [vmem:[#allocation17_spill] sm:$0xff] %v2753_v26  ;;  %393 = vperm.xlu0 %2354, %v352_v24   ;;  %1283 = vperm.xlu1 %2343, %v2556_v51   ;;  %v3674_v24 = vmov 0.0   ;;  %vm765_vm15 = vcmp.eq.s32.totalorder %v2760_v43, %v2640_v11 }
 0x102   : > { %v2065_v49 = vsel %vm661_vm0, 1.0, %v3674_v24  ;;  %v2049_v1 = vsel %vm549_vm1, 1.0, %v3674_v24  ;;  %v2113_v47 = vsel %vm997_vm3, 1.0, %v3674_v24  ;;  %vm887_vm0 = vcmp.eq.s32.totalorder %v2760_v43, %v2717_v52 }
 0x103   : > { %v2756_v35 = vpop.permute.xlu1 %732  ;;  %v709_v21 = vadd.f32 %v2065_v49, %v2049_v1 }
 0x104   : > { %v2758_v9 = vpop.permute.xlu0 %959 }
 0x105   : > { %3695 = vst [vmem:[#allocation18_spill] sm:$0xff] %v2758_v9  ;;  %399 = vperm.xlu0 %2354, %v354_v20   ;;  %1307 = vperm.xlu1 %2343, %v2536_v44   ;;  %v3698_v20 = vmov 4  }
 0x107   : > { %v2767_v8 = vpop.permute.xlu1 %738 }
 0x108   : > { %3696 = vst [vmem:[#allocation19_spill] sm:$0xff] %v2767_v8  ;;  %v2769_v5 = vpop.permute.xlu0 %983 }
 0x109   : > { %3697 = vst [vmem:[#allocation20_spill] sm:$0xff] %v2769_v5  ;;  %493 = vperm.xlu0 %2354, %v2477_v4   ;;  %2344 = vset.pattern.permute.xlu1 %v3698_v20  ;;  %v2097_v4 = vsel %vm885_vm2, 1.0, %v3674_v24 }
 0x10a   : > { %953 = vperm.xlu1 %2344, %v2521_v38  }
 0x10b   : > { %v745_v62 = vpop.permute.xlu1 %744 }
 0x10c   : > { %vm773_vm4 = vcmp.eq.s32.totalorder %v2760_v43, %v745_v62 }
 0x10d   : > { %v2780_v5 = vpop.permute.xlu0 %1053  ;;  %499 = vperm.xlu0 %2354, %v2556_v51   ;;  %v2081_v20 = vsel %vm773_vm4, 1.0, %v3674_v24  ;;  %vm989_vm4 = vcmp.eq.s32.totalorder %v2760_v43, %v2736_v57 }
 0x10e   : > { %3699 = vst [vmem:[#allocation21_spill] sm:$0xff] %v2780_v5  ;;  %v821_v8 = vadd.f32 %v2081_v20, %v709_v21  ;;  %977 = vperm.xlu1 %2344, %v2541_v46   ;;  %v1388_v20 = vld [vmem:[%s2799_s9] sm:$0xff]  ;;  %v3702_v5 = vmov 5  }
 0x10f   : > { %v2787_v9 = vpop.permute.xlu1 %750  ;;  %2364 = vrcp.f32 %v1388_v20 }
 0x110   : > { %v933_v49 = vadd.f32 %v2097_v4, %v821_v8  ;;  %vm775_vm13 = vcmp.eq.s32.totalorder %v2760_v43, %v2787_v9 }
 0x111   : > { %v1081_v55 = vpop.permute.xlu0 %1080  ;;  %505 = vperm.xlu0 %2354, %v2521_v38  }
 0x112   : > { %vm1109_vm5 = vcmp.eq.s32.totalorder %v2760_v43, %v1081_v55  ;;  %v1045_v1 = vadd.f32 %v2113_v47, %v933_v49  ;;  %980 = vperm.xlu1 %2344, %v2507_v28   ;;  %v1389_v49 = vld [vmem:[%s2799_s9 + $0x8] sm:$0xff]  ;;  %v1396_v55 = vld [vmem:[%s2799_s9 + $0x40] sm:$0xff] }
 0x113   : > { %v2129_v51 = vsel %vm1109_vm5, 1.0, %v3674_v24  ;;  %v2793_v62 = vpop.permute.xlu1 %756  ;;  %2366 = vrcp.f32 %v1389_v49  ;;  %v1391_v24 = vld [vmem:[%s2799_s9 + $0x18] sm:$0xff]  ;;  %v1392_v49 = vld [vmem:[%s2799_s9 + $0x20] sm:$0xff] }
 0x114   : > { %v2801_v8 = vadd.f32 %v2129_v51, %v1045_v1  ;;  %2368 = vrcp.f32 %v1396_v55 }
 0x115   : > { %511 = vperm.xlu0 %2354, %v2526_v40   ;;  %v2804_v21 = vpop.permute.xlu0 %1062  ;;  %2370 = vrcp.f32 %v1391_v24  ;;  %v1401_v24 = vld [vmem:[%s2799_s9 + $0x68] sm:$0xff] }
 0x116   : > { %962 = vperm.xlu1 %2344, %v2492_v16   ;;  %vm1103_vm1 = vcmp.eq.s32.totalorder %v2760_v43, %v2804_v21 }
 0x117   : > { %v2807_v4 = vpop.permute.xlu1 %762 }
 0x118   : > { %3700 = vst [vmem:[#allocation22_spill] sm:$0xff] %v2807_v4 }
 0x119   : > { %517 = vperm.xlu0 %2354, %v2531_v42   ;;  %v2811_v47 = vpop.permute.xlu0 %1086  ;;  %v1397_v42 = vld [vmem:[%s2799_s9 + $0x48] sm:$0xff] }
 0x11a   : > { %986 = vperm.xlu1 %2344, %v2512_v32   ;;  %2372 = vrcp.f32 %v1397_v42  ;;  %v3707_v42 = vmov 0   ;;  %vm1111_vm5 = vcmp.eq.s32.totalorder %v2760_v43, %v2811_v47 }
 0x11b   : > { %2374 = vrcp.f32 %v1392_v49 }
 0x11c   : > { %v2816_v1 = vpop.permute.xlu1 %832  ;;  %2376 = vrcp.f32 %v1401_v24 }
 0x11d   : > { %523 = vperm.xlu0 %2354, %v2536_v44   ;;  %v2819_v51 = vpop.permute.xlu0 %1065  ;;  %v2365_v44 = vpop.eup %2364  ;;  %vm877_vm2 = vcmp.eq.s32.totalorder %v2760_v43, %v2816_v1 }
 0x11e   : > { %3701 = vst [vmem:[#allocation23_spill] sm:$0xff] %v2819_v51  ;;  %2346 = vset.pattern.permute.xlu1 %v3702_v5  ;;  %v2367_v26 = vpop.eup %2366 }
 0x11f   : > { %1068 = vperm.xlu1 %2346, %v2487_v12   ;;  %v2369_v49 = vpop.eup %2368 }
 0x120   : > { %v2825_v63 = vpop.permute.xlu1 %835  ;;  %v2371_v59 = vpop.eup %2370 }
 0x121   : > { %3703 = vst [vmem:[#allocation24_spill] sm:$0xff] %v2825_v63  ;;  %529 = vperm.xlu0 %2354, %v2541_v46   ;;  %v2828_v20 = vpop.permute.xlu0 %1092  ;;  %v2356_v63 = vld [vmem:[%s3657_s1] sm:$0xff]  }
 0x122   : > { %3704 = vst [vmem:[#allocation25_spill] sm:$0xff] %v2828_v20  ;;  %2267 = vmatprep.subr.bf16.mxu0 %v2356_v63  ;;  %2299 = vmatprep.subr.bf16.mxu1 %v2356_v63 }
 0x123   : > { %1089 = vperm.xlu1 %2346, %v2541_v46   ;;  %2268 = vmatpush3.bf16.msra.mxu0 %v2356_v63 }
 0x124   : > { %v2832_v51 = vpop.permute.xlu1 %841  ;;  %2307 = vmatpush3.bf16.msra.mxu1 %v2356_v63  ;;  %2269 = vmatprep.subr.bf16.mxu0 %v2357_v2  ;;  %v2373_v24 = vpop.eup %2372  ;;  %v1390_v63 = vld [vmem:[%s2799_s9 + $0x10] sm:$0xff] }
 0x125   : > { %3705 = vst [vmem:[#allocation26_spill] sm:$0xff] %v2832_v51  ;;  %535 = vperm.xlu0 %2354, %v2546_v48   ;;  %v2835_v55 = vpop.permute.xlu0 %1071  ;;  %2300 = vmatprep.subr.bf16.mxu1 %v2357_v2 }
 0x126   : > { %3706 = vst [vmem:[#allocation27_spill] sm:$0xff] %v2835_v55  ;;  %v1395_v55 = vld [vmem:[%s2799_s9 + $0x38] sm:$0xff] }
 0x127   : > { %2347 = vset.pattern.permute.xlu1 %v3707_v42  ;;  %2378 = vrcp.f32 %v1395_v55  ;;  %2270 = vmatpush3.bf16.msra.mxu0 %v2357_v2 }
 0x128   : > { %1422 = vperm.xlu1 %2347, %v2365_v44   ;;  %v2842_v51 = vpop.permute.xlu1 %847  ;;  %2308 = vmatpush3.bf16.msra.mxu1 %v2357_v2  ;;  %v1398_v2 = vld [vmem:[%s2799_s9 + $0x50] sm:$0xff] }
 0x129   : > { %3708 = vst [vmem:[#allocation28_spill] sm:$0xff] %v2842_v51  ;;  %1427 = vperm.xlu0 %2354, %v2367_v26   ;;  %v2844_v20 = vpop.permute.xlu0 %1098  ;;  %v1403_v26 = vld [vmem:[%s2799_s9 + $0x78] sm:$0xff]  ;;  %v2375_v51 = vpop.eup %2374 }
 0x12a   : > { %3709 = vst [vmem:[#allocation29_spill] sm:$0xff] %v2844_v20  ;;  %v2358_v20 = vld [vmem:[%s3657_s1 + $0x10] sm:$0xff]   ;;  %2380 = vrcp.f32 %v1403_v26 }
 0x12b   : > { %2271 = vmatprep.subr.bf16.mxu0 %v2358_v20  ;;  %2301 = vmatprep.subr.bf16.mxu1 %v2358_v20  ;;  %2382 = vrcp.f32 %v1390_v63 }
 0x12c   : > { %1462 = vperm.xlu1 %2347, %v2369_v49   ;;  %v2850_v44 = vpop.permute.xlu1 %853  ;;  %2272 = vmatpush3.bf16.msra.mxu0 %v2358_v20  ;;  %v2377_v49 = vpop.eup %2376  ;;  %2384 = vrcp.f32 %v1398_v2  ;;  %v2362_v2 = vld [vmem:[%s3657_s1 + $0x30] sm:$0xff]  }
 0x12d   : > { %3710 = vst [vmem:[#allocation30_spill] sm:$0xff] %v2850_v44  ;;  %1437 = vperm.xlu0 %2354, %v2371_v59   ;;  %v2359_v59 = vld [vmem:[%s3657_s1 + $0x18] sm:$0xff]   ;;  %2309 = vmatpush3.bf16.msra.mxu1 %v2358_v20 }
 0x12e   : > { %v2856_v4 = vpop.permute.xlu0 %1168  ;;  %2273 = vmatprep.subr.bf16.mxu0 %v2359_v59  ;;  %2302 = vmatprep.subr.bf16.mxu1 %v2359_v59  ;;  %v1399_v20 = vld [vmem:[%s2799_s9 + $0x58] sm:$0xff] }
 0x12f   : > { %2386 = vrcp.f32 %v1399_v20  ;;  %v2363_v20 = vld [vmem:[%s3657_s1 + $0x38] sm:$0xff]  }
 0x130   : > { %1467 = vperm.xlu1 %2347, %v2373_v24   ;;  %v2859_v55 = vpop.permute.xlu1 %859  ;;  %2274 = vmatpush3.bf16.msra.mxu0 %v2359_v59 }
 0x131   : > { %1442 = vperm.xlu0 %2354, %v2375_v51   ;;  %v2360_v51 = vld [vmem:[%s3657_s1 + $0x20] sm:$0xff]   ;;  %v2379_v26 = vpop.eup %2378  ;;  %2310 = vmatpush3.bf16.msra.mxu1 %v2359_v59 }
 0x132   : > { %v2864_v44 = vpop.permute.xlu0 %1171  ;;  %2275 = vmatprep.subr.bf16.mxu0 %v2360_v51  ;;  %2303 = vmatprep.subr.bf16.mxu1 %v2360_v51 }
 0x133   : > { %3711 = vst [vmem:[#allocation31_spill] sm:$0xff] %v2864_v44 }
 0x134   : > { %2348 = vset.pattern.permute.xlu1 %v3702_v5  ;;  %v2868_v24 = vpop.permute.xlu1 %865  ;;  %2276 = vmatpush3.bf16.msra.mxu0 %v2360_v51  ;;  %v2361_v5 = vld [vmem:[%s3657_s1 + $0x28] sm:$0xff]  }
 0x135   : > { %3712 = vst [vmem:[#allocation32_spill] sm:$0xff] %v2868_v24  ;;  %1487 = vperm.xlu0 %2354, %v2377_v49   ;;  %1074 = vperm.xlu1 %2348, %v2492_v16   ;;  %v2381_v49 = vpop.eup %2380 }
 0x136   : > { %v2874_v44 = vpop.permute.xlu0 %1195  ;;  %2311 = vmatpush3.bf16.msra.mxu1 %v2360_v51  ;;  %2277 = vmatprep.subr.bf16.mxu0 %v2361_v5  ;;  %v2383_v59 = vpop.eup %2382 }
 0x137   : > { %2304 = vmatprep.subr.bf16.mxu1 %v2361_v5  ;;  %v2385_v51 = vpop.eup %2384 }
 0x138   : > { %v2877_v63 = vpop.permute.xlu1 %871  ;;  %2278 = vmatpush3.bf16.msra.mxu0 %v2361_v5 }
 0x139   : > { %3713 = vst [vmem:[#allocation33_spill] sm:$0xff] %v2877_v63  ;;  %1457 = vperm.xlu0 %2354, %v2379_v26   ;;  %1095 = vperm.xlu1 %2348, %v2546_v48   ;;  %v2387_v13 = vpop.eup %2386 }
 0x13a   : > { %v2883_v24 = vpop.permute.xlu0 %1177  ;;  %2312 = vmatpush3.bf16.msra.mxu1 %v2361_v5  ;;  %2279 = vmatprep.subr.bf16.mxu0 %v2362_v2 }
 0x13b   : > { %2305 = vmatprep.subr.bf16.mxu1 %v2362_v2 }
 0x13c   : > { %2280 = vmatpush3.bf16.msra.mxu0 %v2362_v2 }
 0x13d   : > { %1497 = vperm.xlu0 %2354, %v2381_v49   ;;  %2350 = vset.pattern.permute.xlu1 %v3707_v42  ;;  %v2889_v26 = vpop.permute.xlu1 %941  ;;  %v3716_v49 = vmov 0.0  }
 0x13e   : > { %3714 = vst [vmem:[#allocation34_spill] sm:$0xff] %v2889_v26  ;;  %v2891_v63 = vpop.permute.xlu0 %1204  ;;  %1432 = vperm.xlu1 %2350, %v2383_v59   ;;  %v2059_v5 = vsel %vm655_vm6, 1.0, %v3716_v49  ;;  %2313 = vmatpush3.bf16.msra.mxu1 %v2362_v2  ;;  %v2075_v50 = vsel %vm767_vm8, 1.0, %v3716_v49  ;;  %v2067_v0 = vsel %vm663_vm9, 1.0, %v3716_v49  ;;  %v2051_v23 = vsel %vm551_vm10, 1.0, %v3716_v49 }
 0x13f   : > { %3715 = vst [vmem:[#allocation35_spill] sm:$0xff] %v2891_v63  ;;  %v2043_v63 = vsel %vm543_vm7, 1.0, %v3716_v49  ;;  %2281 = vmatprep.subr.bf16.mxu0 %v2363_v20  ;;  %2306 = vmatprep.subr.bf16.mxu1 %v2363_v20  ;;  %v2091_v34 = vsel %vm879_vm12, 1.0, %v3716_v49  ;;  %v2083_v9 = vsel %vm775_vm13, 1.0, %v3716_v49  ;;  %v2041_v10 = vsel %vm541_vm14, 1.0, %v3716_v49 }
 0x140   : > { %2282 = vmatpush3.bf16.msra.mxu0 %v2363_v20  ;;  %v703_v59 = vadd.f32 %v2059_v5, %v2043_v63  ;;  %v2057_v63 = vsel %vm653_vm11, 1.0, %v3716_v49  ;;  %v711_v5 = vadd.f32 %v2067_v0, %v2051_v23  ;;  %v2073_v11 = vsel %vm765_vm15, 1.0, %v3716_v49 }
 0x141   : > { %v2904_v56 = vpop.permute.xlu1 %947  ;;  %v2099_v52 = vsel %vm887_vm0, 1.0, %v3716_v49  ;;  %v2123_v23 = vsel %vm1103_vm1, 1.0, %v3716_v49  ;;  %v2089_v1 = vsel %vm877_vm2, 1.0, %v3716_v49  ;;  %v2131_v57 = vsel %vm1111_vm5, 1.0, %v3716_v49 }
 0x142   : > { %v2906_v26 = vpop.permute.xlu0 %1186  ;;  %1472 = vperm.xlu1 %2350, %v2385_v51   ;;  %2314 = vmatpush3.bf16.msra.mxu1 %v2363_v20  ;;  %v815_v51 = vadd.f32 %v2075_v50, %v703_v59  ;;  %v701_v20 = vadd.f32 %v2057_v63, %v2041_v10  ;;  %v823_v50 = vadd.f32 %v2083_v9, %v711_v5 }
 0x143   : > { %3717 = vst [vmem:[#allocation36_spill] sm:$0xff] %v2906_v26  ;;  %v3718_v26 = vmov 6   ;;  %vm1213_vm7 = vcmp.eq.s32.totalorder %v2760_v43, %v2856_v4  ;;  %vm652_vm11 = vcmp.eq.s32.totalorder %v2760_v43, %v2589_v54  ;;  %vm657_vm12 = vcmp.eq.s32.totalorder %v2760_v43, %v2600_v58 }
 0x144   : > { %v927_v59 = vadd.f32 %v2091_v34, %v815_v51  ;;  %v813_v51 = vadd.f32 %v2073_v11, %v701_v20  ;;  %vm659_vm14 = vcmp.eq.s32.totalorder %v2760_v43, %v2606_v60  ;;  %vm665_vm15 = vcmp.eq.s32.totalorder %v2760_v43, %v2624_v3 }
 0x145   : > { %v2923_v2 = vpop.permute.xlu1 %965  ;;  %vm667_vm0 = vcmp.eq.s32.totalorder %v2760_v43, %v2631_v7  ;;  %vm768_vm1 = vcmp.eq.s32.totalorder %v2760_v43, %v2646_v14  ;;  %vm545_vm2 = vcmp.eq.s32.totalorder %v2760_v43, %v2650_v15  ;;  %vm770_vm5 = vcmp.eq.s32.totalorder %v2760_v43, %v2652_v17 }
 0x146   : > { %v2925_v33 = vpop.permute.xlu0 %1210  ;;  %1477 = vperm.xlu1 %2350, %v2387_v13   ;;  %v925_v5 = vadd.f32 %v2089_v1, %v813_v51  ;;  %v3056_v60 = vsel %vm768_vm1, 1.0, %v3716_v49  ;;  %v2045_v3 = vsel %vm545_vm2, 1.0, %v3716_v49  ;;  %vm881_vm1 = vcmp.eq.s32.totalorder %v2760_v43, %v2696_v37 }
 0x147   : > { %vm656_vm2 = vcmp.eq.s32.totalorder %v2760_v43, %v2700_v39 }
 0x149   : > { %v951_v13 = vpop.permute.xlu1 %950 }
 0x14a   : > { %vm991_vm3 = vcmp.eq.s32.totalorder %v2760_v43, %v951_v13  ;;  %2351 = vset.pattern.permute.xlu1 %v3718_v26  ;;  %v935_v26 = vadd.f32 %v2099_v52, %v823_v50  ;;  %v2105_v13 = vsel %vm989_vm4, 1.0, %v3716_v49  ;;  %v2137_v52 = vsel %vm1213_vm7, 1.0, %v3716_v49 }
 0x14b   : > { %v2942_v0 = vpop.permute.xlu0 %1277  ;;  %v2107_v21 = vsel %vm991_vm3, 1.0, %v3716_v49  ;;  %1180 = vperm.xlu1 %2351, %v2487_v12   ;;  %v1037_v50 = vadd.f32 %v2105_v13, %v925_v5  ;;  %v1393_v5 = vld [vmem:[%s2799_s9 + $0x28] sm:$0xff]  ;;  %v1400_v13 = vld [vmem:[%s2799_s9 + $0x60] sm:$0xff]  ;;  %vm553_vm7 = vcmp.eq.s32.totalorder %v2760_v43, %v2675_v27 }
 0x14c   : > { %v1039_v63 = vadd.f32 %v2107_v21, %v927_v59  ;;  %2388 = vrcp.f32 %v1393_v5  ;;  %v3039_v5 = vsel %vm659_vm14, 1.0, %v3716_v49  ;;  %vm769_vm14 = vcmp.eq.s32.totalorder %v2760_v43, %v2756_v35 }
 0x14d   : > { %v975_v34 = vpop.permute.xlu1 %974  ;;  %2390 = vrcp.f32 %v1400_v13  ;;  %3724 = vst [vmem:[#allocation42_spill] sm:$0xff] %v3039_v5  ;;  %v2093_v35 = vsel %vm881_vm1, 1.0, %v3716_v49 }
 0x14e   : > { %vm999_vm6 = vcmp.eq.s32.totalorder %v2760_v43, %v975_v34  ;;  %v2954_v10 = vadd.f32 %v2123_v23, %v1039_v63 }
 0x14f   : > { %v1305_v9 = vpop.permute.xlu0 %1304  ;;  %v2115_v12 = vsel %vm999_vm6, 1.0, %v3716_v49  ;;  %1201 = vperm.xlu1 %2351, %v2541_v46   ;;  %vm547_vm6 = vcmp.eq.s32.totalorder %v2760_v43, %v2656_v18 }
 0x150   : > { %v1047_v59 = vadd.f32 %v2115_v12, %v935_v26  ;;  %vm1333_vm9 = vcmp.eq.s32.totalorder %v2760_v43, %v1305_v9  ;;  %v2061_v9 = vsel %vm657_vm12, 1.0, %v3716_v49  ;;  %vm776_vm12 = vcmp.eq.s32.totalorder %v2760_v43, %v2670_v25 }
 0x152   : > { %v1057_v47 = vpop.permute.xlu1 %1056  ;;  %v2962_v11 = vadd.f32 %v2131_v57, %v1047_v59 }
 0x153   : > { %v1287_v20 = vpop.permute.xlu0 %1286  ;;  %vm1101_vm8 = vcmp.eq.s32.totalorder %v2760_v43, %v1057_v47  ;;  %1183 = vperm.xlu1 %2351, %v2526_v40  }
 0x154   : > { %v2121_v23 = vsel %vm1101_vm8, 1.0, %v3716_v49  ;;  %vm1327_vm13 = vcmp.eq.s32.totalorder %v2760_v43, %v1287_v20 }
 0x155   : > { %v1149_v21 = vadd.f32 %v2121_v23, %v1037_v50  ;;  %v1402_v50 = vld [vmem:[%s2799_s9 + $0x70] sm:$0xff]  ;;  %v2155_v20 = vsel %vm1327_vm13, 1.0, %v3716_v49  ;;  %vm778_vm13 = vcmp.eq.s32.totalorder %v2760_v43, %v2677_v29 }
 0x156   : > { %v2968_v1 = vpop.permute.xlu1 %1077 }
 0x157   : > { %v2970_v63 = vpop.permute.xlu0 %1310  ;;  %1207 = vperm.xlu1 %2351, %v2546_v48   ;;  %v2973_v4 = vadd.f32 %v2137_v52, %v1149_v21  ;;  %v2389_v52 = vpop.eup %2388 }
 0x158   : > { %v2391_v21 = vpop.eup %2390  ;;  %vm1335_vm4 = vcmp.eq.s32.totalorder %v2760_v43, %v2970_v63 }
 0x159   : > { %v2163_v14 = vsel %vm1335_vm4, 1.0, %v3716_v49  ;;  %vm660_vm4 = vcmp.eq.s32.totalorder %v2760_v43, %v2715_v53  ;;  %v3729_v53 = vld [vmem:[#allocation22_spill] sm:$0xff] }
 0x15a   : > { %v2975_v51 = vpop.permute.xlu1 %1059 }
 0x15b   : > { %v2977_v34 = vpop.permute.xlu0 %1292  ;;  %2353 = vset.pattern.permute.xlu1 %v3691_v41 }
 0x15c   : > { %3719 = vst [vmem:[#allocation37_spill] sm:$0xff] %v2977_v34  ;;  %1289 = vperm.xlu1 %2353, %v2521_v38   ;;  %v1394_v38 = vld [vmem:[%s2799_s9 + $0x30] sm:$0xff] }
 0x15d   : > { %2392 = vrcp.f32 %v1394_v38  ;;  %v2071_v38 = vsel %vm667_vm0, 1.0, %v3716_v49  ;;  %vm654_vm0 = vcmp.eq.s32.totalorder %v2760_v43, %v2694_v36  ;;  %v2077_v36 = vsel %vm769_vm14, 1.0, %v3716_v49 }
 0x15e   : > { %v2981_v40 = vpop.permute.xlu1 %1083  ;;  %2394 = vrcp.f32 %v1402_v50 }
 0x15f   : > { %v2983_v26 = vpop.permute.xlu0 %1295 }
 0x160   : > { %3720 = vst [vmem:[#allocation38_spill] sm:$0xff] %v2983_v26  ;;  %1313 = vperm.xlu1 %2353, %v2541_v46   ;;  %v3750_v26 = vld [vmem:[#allocation30_spill] sm:$0xff] }
 0x163   : > { %v2987_v12 = vpop.permute.xlu0 %1319  ;;  %v2989_v48 = vpop.permute.xlu1 %1165 }
 0x164   : > { %3721 = vst [vmem:[#allocation39_spill] sm:$0xff] %v2987_v12  ;;  %1316 = vperm.xlu1 %2353, %v2507_v28   ;;  %v2161_v28 = vsel %vm1333_vm9, 1.0, %v3716_v49  ;;  %vm772_vm9 = vcmp.eq.s32.totalorder %v2760_v43, %v2658_v19  ;;  %v3127_v19 = vsel %vm776_vm12, 1.0, %v3716_v49 }
 0x167   : > { %v2993_v59 = vpop.permute.xlu1 %1189  ;;  %v2393_v17 = vpop.eup %2392 }
 0x168   : > { %v2995_v41 = vpop.permute.xlu0 %357  ;;  %1298 = vperm.xlu1 %2353, %v2492_v16   ;;  %v2395_v18 = vpop.eup %2394 }
 0x16b   : > { %v1193_v46 = vpop.permute.xlu1 %1192 }
 0x16c   : > { %v3000_v57 = vpop.permute.xlu0 %360  ;;  %vm1221_vm10 = vcmp.eq.s32.totalorder %v2760_v43, %v1193_v46  ;;  %1322 = vperm.xlu1 %2353, %v2512_v32   ;;  %v705_v46 = vadd.f32 %v2061_v9, %v2045_v3 }
 0x16d   : > { %v2145_v47 = vsel %vm1221_vm10, 1.0, %v3716_v49  ;;  %vm555_vm10 = vcmp.eq.s32.totalorder %v2760_v43, %v2681_v30 }
 0x16e   : > { %v1269_v16 = vadd.f32 %v2145_v47, %v2801_v8  ;;  %v3030_v8 = vsel %vm652_vm11, 1.0, %v3716_v49  ;;  %vm774_vm11 = vcmp.eq.s32.totalorder %v2760_v43, %v2664_v22  ;;  %v2053_v47 = vsel %vm553_vm7, 1.0, %v3716_v49 }
 0x16f   : > { %v1175_v32 = vpop.permute.xlu1 %1174  ;;  %v3098_v22 = vsel %vm547_vm6, 1.0, %v3716_v49  ;;  %v3115_v9 = vsel %vm774_vm11, 1.0, %v3716_v49  ;;  %vm889_vm6 = vcmp.eq.s32.totalorder %v2760_v43, %v2724_v61  ;;  %vm777_vm7 = vcmp.eq.s32.totalorder %v2760_v43, %v2793_v62  ;;  %v3731_v62 = vld [vmem:[#allocation12_spill] sm:$0xff] }
 0x170   : > { %v3021_v54 = vpop.permute.xlu0 %369  ;;  %vm1215_vm3 = vcmp.eq.s32.totalorder %v2760_v43, %v1175_v32  ;;  %2355 = vset.pattern.permute.xlu1 %v3707_v42  ;;  %v3027_v58 = vadd.f32 %v2161_v28, %v1269_v16  ;;  %v2069_v42 = vsel %vm665_vm15, 1.0, %v3716_v49  ;;  %v3080_v28 = vsel %vm770_vm5, 1.0, %v3716_v49 }
 0x171   : > { %3722 = vst [vmem:[#allocation40_spill] sm:$0xff] %v3021_v54  ;;  %v2139_v23 = vsel %vm1215_vm3, 1.0, %v3716_v49  ;;  %1447 = vperm.xlu1 %2355, %v2389_v52   ;;  %v2055_v52 = vsel %vm555_vm10, 1.0, %v3716_v49  ;;  %vm876_vm15 = vcmp.eq.s32.totalorder %v2760_v43, %v2684_v31  ;;  %v713_v30 = vadd.f32 %v2069_v42, %v2053_v47  ;;  %v3730_v42 = vld [vmem:[#allocation11_spill] sm:$0xff] }
 0x172   : > { %3723 = vst [vmem:[#allocation41_spill] sm:$0xff] %v3027_v58  ;;  %v1263_v13 = vadd.f32 %v2139_v23, %v2954_v10  ;;  %v3133_v31 = vsel %vm778_vm13, 1.0, %v3716_v49  ;;  %v715_v37 = vadd.f32 %v2071_v38, %v2055_v52  ;;  %vm658_vm3 = vcmp.eq.s32.totalorder %v2760_v43, %v2707_v45  ;;  %v3733_v38 = vld [vmem:[#allocation17_spill] sm:$0xff]  ;;  %v3737_v47 = vld [vmem:[#allocation15_spill] sm:$0xff]  ;;  %v3738_v52 = vld [vmem:[#allocation16_spill] sm:$0xff] }
 0x173   : > { %v1199_v10 = vpop.permute.xlu1 %1198  ;;  %v3148_v29 = vsel %vm876_vm15, 1.0, %v3716_v49  ;;  %vm662_vm5 = vcmp.eq.s32.totalorder %v2760_v43, %v2722_v6  ;;  %v817_v45 = vadd.f32 %v2077_v36, %v705_v46  ;;  %v3165_v23 = vsel %vm656_vm2, 1.0, %v3716_v49 }
 0x174   : > { %v3064_v63 = vpop.permute.xlu0 %375  ;;  %vm1223_vm8 = vcmp.eq.s32.totalorder %v2760_v43, %v1199_v10  ;;  %v3071_v7 = vadd.f32 %v2155_v20, %v1263_v13  ;;  %v3151_v20 = vsel %vm654_vm0, 1.0, %v3716_v49  ;;  %v3171_v6 = vsel %vm660_vm4, 1.0, %v3716_v49  ;;  %v3732_v13 = vld [vmem:[#allocation13_spill] sm:$0xff] }
 0x175   : > { %3725 = vst [vmem:[#allocation43_spill] sm:$0xff] %v3064_v63  ;;  %v2147_v15 = vsel %vm1223_vm8, 1.0, %v3716_v49  ;;  %1482 = vperm.xlu1 %2355, %v2391_v21   ;;  %vm779_vm8 = vcmp.eq.s32.totalorder %v2760_v43, %v3729_v53  ;;  %v3168_v21 = vsel %vm658_vm3, 1.0, %v3716_v49  ;;  %v3176_v61 = vsel %vm662_vm5, 1.0, %v3716_v49 }
 0x176   : > { %3726 = vst [vmem:[#allocation44_spill] sm:$0xff] %v3071_v7  ;;  %v1271_v27 = vadd.f32 %v2147_v15, %v2962_v11  ;;  %v3104_v11 = vsel %vm772_vm9, 1.0, %v3716_v49  ;;  %vm664_vm9 = vcmp.eq.s32.totalorder %v2760_v43, %v3730_v42  ;;  %vm891_vm10 = vcmp.eq.s32.totalorder %v2760_v43, %v3731_v62  ;;  %v3739_v62 = vld [vmem:[#allocation18_spill] sm:$0xff] }
 0x177   : > { %vm666_vm11 = vcmp.eq.s32.totalorder %v2760_v43, %v3732_v13  ;;  %vm993_vm12 = vcmp.eq.s32.totalorder %v2760_v43, %v3733_v38  ;;  %v2101_v10 = vsel %vm889_vm6, 1.0, %v3716_v49  ;;  %v2085_v15 = vsel %vm777_vm7, 1.0, %v3716_v49  ;;  %v3740_v38 = vld [vmem:[#allocation21_spill] sm:$0xff] }
 0x178   : > { %v3092_v50 = vpop.permute.xlu0 %381  ;;  %v3110_v16 = vpop.permute.xlu1 %1280  ;;  %v3112_v32 = vadd.f32 %v2163_v14, %v1271_v27  ;;  %v3735_v14 = vld [vmem:[#allocation14_spill] sm:$0xff]  ;;  %v3194_v27 = vsel %vm664_vm9, 1.0, %v3716_v49  ;;  %vm766_vm14 = vcmp.eq.s32.totalorder %v2760_v43, %v3737_v47  ;;  %vm998_vm15 = vcmp.eq.s32.totalorder %v2760_v43, %v3738_v52  ;;  %v3742_v52 = vld [vmem:[#allocation23_spill] sm:$0xff] }
 0x179   : > { %1452 = vperm.xlu1 %2355, %v2393_v17   ;;  %vm764_vm13 = vcmp.eq.s32.totalorder %v2760_v43, %v3735_v14  ;;  %v2087_v17 = vsel %vm779_vm8, 1.0, %v3716_v49  ;;  %v2103_v36 = vsel %vm891_vm10, 1.0, %v3716_v49  ;;  %v3202_v53 = vsel %vm666_vm11, 1.0, %v3716_v49 }
 0x17a   : > { %3727 = vst [vmem:[#allocation45_spill] sm:$0xff] %v3112_v32  ;;  %v2109_v42 = vsel %vm993_vm12, 1.0, %v3716_v49  ;;  %vm994_vm0 = vcmp.eq.s32.totalorder %v2760_v43, %v3739_v62  ;;  %v2072_v13 = vsel %vm764_vm13, 1.0, %v3716_v49  ;;  %vm1100_vm1 = vcmp.eq.s32.totalorder %v2760_v43, %v3740_v38  ;;  %v3747_v38 = vld [vmem:[#allocation27_spill] sm:$0xff]  ;;  %v3753_v32 = vld [vmem:[#allocation33_spill] sm:$0xff] }
 0x17b   : > { %v825_v14 = vadd.f32 %v2085_v15, %v713_v30  ;;  %v827_v47 = vadd.f32 %v2087_v17, %v715_v37  ;;  %vm1104_vm2 = vcmp.eq.s32.totalorder %v2760_v43, %v3742_v52  ;;  %v3223_v54 = vsel %vm994_vm0, 1.0, %v3716_v49  ;;  %v3745_v30 = vld [vmem:[#allocation25_spill] sm:$0xff]  ;;  %v3746_v37 = vld [vmem:[#allocation26_spill] sm:$0xff]  ;;  %v3748_v52 = vld [vmem:[#allocation28_spill] sm:$0xff] }
 0x17c   : > { %v3145_v25 = vpop.permute.xlu0 %387  ;;  %v3156_v39 = vpop.permute.xlu1 %1301  ;;  %vm1113_vm4 = vcmp.eq.s32.totalorder %v2760_v43, %v3745_v30  ;;  %vm880_vm5 = vcmp.eq.s32.totalorder %v2760_v43, %v3746_v37  ;;  %v2120_v17 = vsel %vm1100_vm1, 1.0, %v3716_v49  ;;  %vm1106_vm6 = vcmp.eq.s32.totalorder %v2760_v43, %v3747_v38 }
 0x17d   : > { %3728 = vst [vmem:[#allocation46_spill] sm:$0xff] %v3145_v25  ;;  %1492 = vperm.xlu1 %2355, %v2395_v18   ;;  %v929_v18 = vadd.f32 %v2093_v35, %v817_v45  ;;  %v2074_v35 = vsel %vm766_vm14, 1.0, %v3716_v49  ;;  %v3214_v45 = vsel %vm998_vm15, 1.0, %v3716_v49  ;;  %vm882_vm7 = vcmp.eq.s32.totalorder %v2760_v43, %v3748_v52 }
 0x17e   : > { %v937_v37 = vadd.f32 %v2101_v10, %v825_v14  ;;  %v3248_v38 = vsel %vm880_vm5, 1.0, %v3716_v49  ;;  %vm884_vm9 = vcmp.eq.s32.totalorder %v2760_v43, %v3750_v26  ;;  %v3254_v52 = vsel %vm1106_vm6, 1.0, %v3716_v49  ;;  %v3752_v26 = vld [vmem:[#allocation32_spill] sm:$0xff] }
 0x17f   : > { %v3229_v15 = vadd.f32 %v2109_v42, %v929_v18  ;;  %v3242_v18 = vadd.f32 %v2103_v36, %v827_v47  ;;  %v3245_v42 = vsel %vm1113_vm4, 1.0, %v3716_v49  ;;  %vm886_vm11 = vcmp.eq.s32.totalorder %v2760_v43, %v2859_v55  ;;  %v3751_v47 = vld [vmem:[#allocation31_spill] sm:$0xff] }
 0x180   : > { %v3184_v3 = vpop.permute.xlu0 %393  ;;  %v3191_v46 = vpop.permute.xlu1 %1283  ;;  %vm1214_vm12 = vcmp.eq.s32.totalorder %v2760_v43, %v3751_v47  ;;  %vm888_vm13 = vcmp.eq.s32.totalorder %v2760_v43, %v3752_v26  ;;  %v3271_v34 = vsel %vm884_vm9, 1.0, %v3716_v49  ;;  %vm1222_vm14 = vcmp.eq.s32.totalorder %v2760_v43, %v2874_v44  ;;  %v3755_v47 = vld [vmem:[#allocation35_spill] sm:$0xff] }
 0x181   : > { %3734 = vst [vmem:[#allocation22_spill] sm:$0xff] %v3184_v3  ;;  %3736 = vst [vmem:[#allocation11_spill] sm:$0xff] %v3191_v46  ;;  %v3743_v3 = vld [vmem:[#allocation24_spill] sm:$0xff]  ;;  %vm890_vm15 = vcmp.eq.s32.totalorder %v2760_v43, %v3753_v32  ;;  %vm1216_vm0 = vcmp.eq.s32.totalorder %v2760_v43, %v2883_v24  ;;  %v2138_v44 = vsel %vm1214_vm12, 1.0, %v3716_v49  ;;  %v3289_v26 = vsel %vm888_vm13, 1.0, %v3716_v49 }
 0x182   : > { %vm878_vm3 = vcmp.eq.s32.totalorder %v2760_v43, %v3743_v3  ;;  %v3749_v3 = vld [vmem:[#allocation29_spill] sm:$0xff]  ;;  %vm990_vm4 = vcmp.eq.s32.totalorder %v2760_v43, %v2904_v56  ;;  %vm1212_vm5 = vcmp.eq.s32.totalorder %v2760_v43, %v2989_v48  ;;  %vm1227_vm13 = vcmp.eq.s32.totalorder %v2760_v43, %v2925_v33 }
 0x183   : > { %vm1115_vm8 = vcmp.eq.s32.totalorder %v2760_v43, %v3749_v3  ;;  %v2090_v30 = vsel %vm878_vm3, 1.0, %v3716_v49  ;;  %v3257_v3 = vsel %vm882_vm7, 1.0, %v3716_v49  ;;  %vm996_vm7 = vcmp.eq.s32.totalorder %v2760_v43, %v2923_v2 }
 0x184   : > { %v3210_v63 = vpop.permute.xlu0 %399  ;;  %v3220_v62 = vpop.permute.xlu1 %1307  ;;  %v3260_v10 = vsel %vm1115_vm8, 1.0, %v3716_v49  ;;  %vm1324_vm8 = vcmp.eq.s32.totalorder %v2760_v43, %v2942_v0  ;;  %v2151_v2 = vsel %vm1227_vm13, 1.0, %v3716_v49 }
 0x185   : > { %3741 = vst [vmem:[#allocation12_spill] sm:$0xff] %v3210_v63  ;;  %3744 = vst [vmem:[#allocation13_spill] sm:$0xff] %v3220_v62  ;;  %v3239_v63 = vsel %vm1104_vm2, 1.0, %v3716_v49  ;;  %v3754_v62 = vld [vmem:[#allocation34_spill] sm:$0xff]  ;;  %vm1225_vm2 = vcmp.eq.s32.totalorder %v2760_v43, %v3755_v47  ;;  %v3311_v47 = vsel %vm1216_vm0, 1.0, %v3716_v49 }
 0x186   : > { %vm988_vm1 = vcmp.eq.s32.totalorder %v2760_v43, %v3754_v62  ;;  %v3295_v62 = vsel %vm1222_vm14, 1.0, %v3716_v49  ;;  %v2149_v56 = vsel %vm1225_vm2, 1.0, %v3716_v49  ;;  %vm404_vm14 = vcmp.eq.s32.totalorder %v2760_v43, %v2995_v41 }
 0x187   : > { %v2104_v46 = vsel %vm988_vm1, 1.0, %v3716_v49  ;;  %vm1108_vm1 = vcmp.eq.s32.totalorder %v2760_v43, %v2968_v1  ;;  %v2024_v33 = vsel %vm404_vm14, 1.0, %v3716_v49  ;;  %vm405_vm2 = vcmp.eq.s32.totalorder %v2760_v43, %v3000_v57 }
 0x188   : > { %v494_v12 = vpop.permute.xlu0 %493 }
 0x189   : > { %vm540_vm10 = vcmp.eq.s32.totalorder %v2760_v43, %v494_v12  ;;  %v954_v14 = vpop.permute.xlu1 %953 }
 0x18a   : > { %v2040_v36 = vsel %vm540_vm10, 1.0, %v3716_v49  ;;  %vm1102_vm10 = vcmp.eq.s32.totalorder %v2760_v43, %v2975_v51  ;;  %v2152_v51 = vsel %vm1324_vm8, 1.0, %v3716_v49 }
 0x18b   : > { %v700_v12 = vadd.f32 %v3030_v8, %v2040_v36  ;;  %v3285_v36 = vsel %vm886_vm11, 1.0, %v3716_v49  ;;  %vm992_vm11 = vcmp.eq.s32.totalorder %v2760_v43, %v954_v14 }
 0x18c   : > { %v500_v55 = vpop.permute.xlu0 %499  ;;  %v2108_v0 = vsel %vm992_vm11, 1.0, %v3716_v49 }
 0x18d   : > { %v812_v8 = vadd.f32 %v2072_v13, %v700_v12  ;;  %vm542_vm3 = vcmp.eq.s32.totalorder %v2760_v43, %v500_v55  ;;  %v3292_v25 = vpop.permute.xlu1 %977  ;;  %v3305_v55 = vsel %vm890_vm15, 1.0, %v3716_v49 }
 0x18e   : > { %v2042_v7 = vsel %vm542_vm3, 1.0, %v3716_v49  ;;  %vm1000_vm13 = vcmp.eq.s32.totalorder %v2760_v43, %v3292_v25 }
 0x18f   : > { %v924_v13 = vadd.f32 %v3148_v29, %v812_v8  ;;  %v702_v12 = vadd.f32 %v3151_v20, %v2042_v7  ;;  %v2106_v29 = vsel %vm990_vm4, 1.0, %v3716_v49  ;;  %vm1110_vm4 = vcmp.eq.s32.totalorder %v2760_v43, %v2981_v40 }
 0x190   : > { %v506_v58 = vpop.permute.xlu0 %505 }
 0x191   : > { %v814_v7 = vadd.f32 %v2074_v35, %v702_v12  ;;  %vm544_vm6 = vcmp.eq.s32.totalorder %v2760_v43, %v506_v58  ;;  %v1036_v32 = vadd.f32 %v2104_v46, %v924_v13  ;;  %v981_v20 = vpop.permute.xlu1 %980  ;;  %v2136_v58 = vsel %vm1212_vm5, 1.0, %v3716_v49 }
 0x192   : > { %v2044_v24 = vsel %vm544_vm6, 1.0, %v3716_v49  ;;  %vm1001_vm9 = vcmp.eq.s32.totalorder %v2760_v43, %v981_v20  ;;  %vm1220_vm5 = vcmp.eq.s32.totalorder %v2760_v43, %v2993_v59  ;;  %vm1325_vm6 = vcmp.eq.s32.totalorder %v2760_v43, %v3110_v16 }
 0x193   : > { %v926_v8 = vadd.f32 %v2090_v30, %v814_v7  ;;  %v704_v5 = vadd.f32 %v3165_v23, %v2044_v24  ;;  %v1148_v48 = vadd.f32 %v2120_v17, %v1036_v32  ;;  %v2117_v46 = vsel %vm1001_vm9, 1.0, %v3716_v49 }
 0x194   : > { %v512_v35 = vpop.permute.xlu0 %511  ;;  %v1049_v12 = vadd.f32 %v2117_v46, %v937_v37  ;;  %v2122_v32 = vsel %vm1102_vm10, 1.0, %v3716_v49  ;;  %v2112_v24 = vsel %vm996_vm7, 1.0, %v3716_v49  ;;  %v2144_v1 = vsel %vm1220_vm5, 1.0, %v3716_v49 }
 0x195   : > { %v816_v13 = vadd.f32 %v3056_v60, %v704_v5  ;;  %vm546_vm12 = vcmp.eq.s32.totalorder %v2760_v43, %v512_v35  ;;  %v1260_v30 = vadd.f32 %v2136_v58, %v1148_v48  ;;  %v3340_v17 = vpop.permute.xlu1 %962  ;;  %v1038_v7 = vadd.f32 %v2106_v29, %v926_v8 }
 0x196   : > { %v2046_v23 = vsel %vm546_vm12, 1.0, %v3716_v49  ;;  %v1161_v60 = vadd.f32 %v3245_v42, %v1049_v12  ;;  %vm1332_vm12 = vcmp.eq.s32.totalorder %v2760_v43, %v3156_v39 }
 0x197   : > { %v928_v5 = vadd.f32 %v3248_v38, %v816_v13  ;;  %v706_v37 = vadd.f32 %v3168_v21, %v2046_v23  ;;  %v3353_v48 = vadd.f32 %v2152_v51, %v1260_v30  ;;  %v1150_v29 = vadd.f32 %v2122_v32, %v1038_v7  ;;  %v1524_v23 = vld [vmem:[%s3400_s7] sm:$0xf] }
 0x198   : > { %v518_v20 = vpop.permute.xlu0 %517  ;;  %v3366_v58 = vadd.f32 %v2149_v56, %v1161_v60  ;;  %v2219_v51 = vpack.c.bf16 %v2024_v33, %v2024_v33 }
 0x199   : > { %v818_v42 = vadd.f32 %v3080_v28, %v706_v37  ;;  %vm548_vm15 = vcmp.eq.s32.totalorder %v2760_v43, %v518_v20  ;;  %v1040_v21 = vadd.f32 %v2108_v0, %v928_v5  ;;  %v987_v14 = vpop.permute.xlu1 %986  ;;  %v3364_v8 = vadd.f32 %v2138_v44, %v1150_v29 }
 0x19a   : > { %v2048_v38 = vsel %vm548_vm15, 1.0, %v3716_v49  ;;  %vm1003_vm0 = vcmp.eq.s32.totalorder %v2760_v43, %v987_v14  ;;  %v2128_v5 = vsel %vm1108_vm1, 1.0, %v3716_v49  ;;  %vm412_vm15 = vcmp.eq.s32.totalorder %v2760_v43, %v3092_v50 }
 0x19b   : > { %v930_v41 = vadd.f32 %v3257_v3, %v818_v42  ;;  %v708_v28 = vadd.f32 %v3171_v6, %v2048_v38  ;;  %v1152_v46 = vadd.f32 %v3239_v63, %v1040_v21  ;;  %v2119_v44 = vsel %vm1003_vm0, 1.0, %v3716_v49  ;;  %v1525_v38 = vld [vmem:[%s3400_s7 + $0x4] sm:$0xf] }
 0x19c   : > { %v524_v56 = vpop.permute.xlu0 %523  ;;  %v1051_v6 = vadd.f32 %v2119_v44, %v3242_v18 }
 0x19d   : > { %v820_v3 = vadd.f32 %v3104_v11, %v708_v28  ;;  %vm550_vm3 = vcmp.eq.s32.totalorder %v2760_v43, %v524_v56  ;;  %v1042_v63 = vadd.f32 %v3223_v54, %v930_v41  ;;  %v3389_v13 = vadd.f32 %v3311_v47, %v1152_v46  ;;  %v3758_v47 = vld [vmem:[#allocation20_spill] sm:$0xff] }
 0x19e   : > { %v2050_v35 = vsel %vm550_vm3, 1.0, %v3716_v49  ;;  %v1163_v11 = vadd.f32 %v3260_v10, %v1051_v6  ;;  %v1069_v30 = vpop.permute.xlu1 %1068  ;;  %v3757_v10 = vld [vmem:[#allocation19_spill] sm:$0xff]  ;;  %vm1002_vm10 = vcmp.eq.s32.totalorder %v2760_v43, %v3758_v47  ;;  %v2116_v28 = vsel %vm1000_vm13, 1.0, %v3716_v49 }
 0x19f   : > { %v932_v12 = vadd.f32 %v3271_v34, %v820_v3  ;;  %v710_v18 = vadd.f32 %v3176_v61, %v2050_v35  ;;  %v3395_v54 = vadd.f32 %v3254_v52, %v1042_v63  ;;  %v2025_v34 = vsel %vm405_vm2, 1.0, %v3716_v49  ;;  %v3756_v52 = vld [vmem:[#allocation6_spill] sm:$0xff] }
 0x1a0   : > { %vm1105_vm7 = vcmp.eq.s32.totalorder %v2760_v43, %v1069_v30  ;;  %v530_v61 = vpop.permute.xlu0 %529  ;;  %vm413_vm8 = vcmp.eq.s32.totalorder %v2760_v43, %v3756_v52  ;;  %vm771_vm9 = vcmp.eq.s32.totalorder %v2760_v43, %v3757_v10  ;;  %v3427_v0 = vadd.f32 %v2151_v2, %v1163_v11 }
 0x1a1   : > { %v822_v7 = vadd.f32 %v3115_v9, %v710_v18  ;;  %v2125_v57 = vsel %vm1105_vm7, 1.0, %v3716_v49  ;;  %vm552_vm11 = vcmp.eq.s32.totalorder %v2760_v43, %v530_v61  ;;  %v1044_v32 = vadd.f32 %v2112_v24, %v932_v12  ;;  %v3759_v61 = vld [vmem:[#allocation42_spill] sm:$0xff] }
 0x1a2   : > { %v3424_v60 = vadd.f32 %v2125_v57, %v3229_v15  ;;  %v2052_v37 = vsel %vm552_vm11, 1.0, %v3716_v49  ;;  %v2130_v9 = vsel %vm1110_vm4, 1.0, %v3716_v49  ;;  %v1090_v29 = vpop.permute.xlu1 %1089  ;;  %v1596_v15 = vadd.bf16 %v2219_v51, %v1524_v23  ;;  %v3760_v23 = vld [vmem:[#allocation10_spill] sm:$0xff] }
 0x1a3   : > { %v934_v20 = vadd.f32 %v3285_v36, %v822_v7  ;;  %v712_v24 = vadd.f32 %v3194_v27, %v2052_v37  ;;  %v1156_v42 = vadd.f32 %v2128_v5, %v1044_v32  ;;  %v2220_v21 = vpack.c.bf16 %v2025_v34, %v2025_v34  ;;  %v1532_v7 = vld [vmem:[%s3400_s7 + $0x20] sm:$0xf]  ;;  %v1533_v37 = vld [vmem:[%s3400_s7 + $0x24] sm:$0xf] }
 0x1a4   : > { %v2153_v2 = vsel %vm1325_vm6, 1.0, %v3716_v49  ;;  %v536_v40 = vpop.permute.xlu0 %535  ;;  %vm1112_vm0 = vcmp.eq.s32.totalorder %v2760_v43, %v1090_v29  ;;  %v2079_v50 = vsel %vm771_vm9, 1.0, %v3716_v49  ;;  %v707_v52 = vadd.f32 %v3759_v61, %v3098_v22  ;;  %v3761_v29 = vld [vmem:[#allocation41_spill] sm:$0xff] }
 0x1a5   : > { %v824_v27 = vadd.f32 %v3127_v19, %v712_v24  ;;  %vm554_vm14 = vcmp.eq.s32.totalorder %v2760_v43, %v536_v40  ;;  %v1268_v36 = vadd.f32 %v2144_v1, %v1156_v42  ;;  %v1046_v16 = vadd.f32 %v3214_v45, %v934_v20 }
 0x1a6   : > { %v2054_v59 = vsel %vm554_vm14, 1.0, %v3716_v49  ;;  %v1373_v25 = vadd.f32 %v2153_v2, %v2973_v4  ;;  %v1597_v41 = vadd.bf16 %v2220_v21, %v1525_v38  ;;  %v2160_v19 = vsel %vm1332_vm12, 1.0, %v3716_v49 }
 0x1a7   : > { %v936_v14 = vadd.f32 %v3289_v26, %v824_v27  ;;  %v714_v39 = vadd.f32 %v3202_v53, %v2054_v59  ;;  %v1423_v46 = vpop.permute.xlu1 %1422  ;;  %v1158_v44 = vadd.f32 %v2130_v9, %v1046_v16  ;;  %v2032_v53 = vsel %vm412_vm15, 1.0, %v3716_v49  ;;  %v3762_v27 = vld [vmem:[#allocation2_spill] sm:$0xff] }
 0x1a8   : > { %v1428_v33 = vpop.permute.xlu0 %1427  ;;  %v1500_v45 = vmul.f32 %v1423_v46, %v3353_v48  ;;  %v2132_v4 = vsel %vm1112_vm0, 1.0, %v3716_v49  ;;  %v1380_v6 = vadd.f32 %v2160_v19, %v1268_v36  ;;  %v2033_v48 = vsel %vm413_vm8, 1.0, %v3716_v49  ;;  %v3764_v36 = vld [vmem:[#allocation3_spill] sm:$0xff] }
 0x1a9   : > { %v1048_v56 = vadd.f32 %v2116_v28, %v936_v14  ;;  %v826_v3 = vadd.f32 %v3133_v31, %v714_v39  ;;  %v1501_v26 = vmul.f32 %v1428_v33, %v1373_v25  ;;  %v3468_v63 = vadd.f32 %v3295_v62, %v1158_v44  ;;  %v3765_v28 = vld [vmem:[#allocation11_spill] sm:$0xff] }
 0x1aa   : > { %v2235_v12 = vpack.c.bf16 %v1500_v45, %v1500_v45  ;;  %v2118_v62 = vsel %vm1002_vm10, 1.0, %v3716_v49  ;;  %v2227_v30 = vpack.c.bf16 %v2032_v53, %v2032_v53  ;;  %vm883_vm1 = vcmp.eq.s32.totalorder %v2760_v43, %v3760_v23 }
 0x1ab   : > { %v3470_v35 = vadd.f32 %v2132_v4, %v1048_v56  ;;  %v2236_v11 = vpack.c.bf16 %v1501_v26, %v1501_v26  ;;  %v938_v31 = vadd.f32 %v3305_v55, %v826_v3  ;;  %v1463_v18 = vpop.permute.xlu1 %1462  ;;  %v2228_v57 = vpack.c.bf16 %v2033_v48, %v2033_v48  ;;  %v3766_v56 = vld [vmem:[#allocation46_spill] sm:$0xff]  ;;  %v3767_v3 = vld [vmem:[#allocation44_spill] sm:$0xff]  ;;  %v1527_v48 = vld [vmem:[%s3400_s7 + $0xc] sm:$0xf] }
 0x1ac   : > { %v1508_v51 = vmul.f32 %v1463_v18, %v1380_v6  ;;  %v1668_v55 = vadd.bf16 %v2235_v12, %v1596_v15  ;;  %v819_v5 = vadd.f32 %v2079_v50, %v707_v52  ;;  %vm995_vm2 = vcmp.eq.s32.totalorder %v2760_v43, %v3340_v17  ;;  %v3763_v17 = vld [vmem:[#allocation36_spill] sm:$0xff]  ;;  %v1438_v39 = vpop.permute.xlu0 %1437  ;;  %v3768_v6 = vld [vmem:[#allocation13_spill] sm:$0xff] }
 0x1ad   : > { %v1669_v34 = vadd.bf16 %v2236_v11, %v1597_v41  ;;  %v3490_v10 = vadd.f32 %v2118_v62, %v938_v31  ;;  %v2095_v9 = vsel %vm883_vm1, 1.0, %v3716_v49  ;;  %v1604_v20 = vadd.bf16 %v2227_v30, %v1532_v7  ;;  %v1526_v11 = vld [vmem:[%s3400_s7 + $0x8] sm:$0xf] }
 0x1ae   : > { %v2243_v24 = vpack.c.bf16 %v1508_v51, %v1508_v51  ;;  %v2111_v42 = vsel %vm995_vm2, 1.0, %v3716_v49  ;;  %v1605_v15 = vadd.bf16 %v2228_v57, %v1533_v37  ;;  %v931_v21 = vadd.f32 %v2095_v9, %v819_v5  ;;  %v3769_v62 = vld [vmem:[#allocation7_spill] sm:$0xff] }
 0x1af   : > { %v2201_v32 = vcombine.low %v1668_v55, %v1669_v34  ;;  %v1468_v47 = vpop.permute.xlu1 %1467  ;;  %vm406_vm3 = vcmp.eq.s32.totalorder %v2760_v43, %v3762_v27  ;;  %vm1219_vm4 = vcmp.eq.s32.totalorder %v2760_v43, %v3763_v17  ;;  %vm407_vm6 = vcmp.eq.s32.totalorder %v2760_v43, %v3764_v36  ;;  %v1534_v7 = vld [vmem:[%s3400_s7 + $0x28] sm:$0xf] }
 0x1b0   : > { %v1509_v22 = vmul.f32 %v1468_v47, %v3761_v29  ;;  %v1676_v40 = vadd.bf16 %v2243_v24, %v1604_v20  ;;  %v1043_v59 = vadd.f32 %v2111_v42, %v931_v21  ;;  %v2026_v41 = vsel %vm406_vm3, 1.0, %v3716_v49 }
 0x1b1   : > { %2283 = vmatprep.mubr.bf16.mxu0 %v2201_v32  ;;  %v2143_v19 = vsel %vm1219_vm4, 1.0, %v3716_v49  ;;  %vm1326_vm7 = vcmp.eq.s32.totalorder %v2760_v43, %v3765_v28  ;;  %v2027_v33 = vsel %vm407_vm6, 1.0, %v3716_v49  ;;  %vm414_vm8 = vcmp.eq.s32.totalorder %v2760_v43, %v3766_v56  ;;  %v3773_v56 = vld [vmem:[#allocation39_spill] sm:$0xff] }
 0x1b2   : > { %v2244_v1 = vpack.c.bf16 %v1509_v22, %v1509_v22  ;;  %v1503_v45 = vmul.f32 %v1438_v39, %v3767_v3  ;;  %v2221_v26 = vpack.c.bf16 %v2026_v41, %v2026_v41  ;;  %v2154_v53 = vsel %vm1326_vm7, 1.0, %v3716_v49  ;;  %v1535_v22 = vld [vmem:[%s3400_s7 + $0x2c] sm:$0xf] }
 0x1b3   : > { %v2222_v4 = vpack.c.bf16 %v2027_v33, %v2027_v33  ;;  %vm1334_vm9 = vcmp.eq.s32.totalorder %v2760_v43, %v3768_v6  ;;  %v1374_v12 = vadd.f32 %v2154_v53, %v3364_v8  ;;  %v2034_v31 = vsel %vm414_vm8, 1.0, %v3716_v49 }
 0x1b4   : > { %v1075_v2 = vpop.permute.xlu1 %1074  ;;  %v1677_v38 = vadd.bf16 %v2244_v1, %v1605_v15  ;;  %vm415_vm10 = vcmp.eq.s32.totalorder %v2760_v43, %v3769_v62  ;;  %v2238_v18 = vpack.c.bf16 %v1503_v45, %v1503_v45  ;;  %v2162_v51 = vsel %vm1334_vm9, 1.0, %v3716_v49  ;;  %v3770_v1 = vld [vmem:[#allocation45_spill] sm:$0xff]  ;;  %v3774_v45 = vld [vmem:[#allocation40_spill] sm:$0xff] }
 0x1b5   : > { %vm1107_vm5 = vcmp.eq.s32.totalorder %v2760_v43, %v1075_v2  ;;  %v1598_v55 = vadd.bf16 %v2221_v26, %v1526_v11  ;;  %v2229_v34 = vpack.c.bf16 %v2034_v31, %v2034_v31  ;;  %v1599_v61 = vadd.bf16 %v2222_v4, %v1527_v48  ;;  %v1528_v48 = vld [vmem:[%s3400_s7 + $0x10] sm:$0xf] }
 0x1b6   : > { %v2127_v16 = vsel %vm1107_vm5, 1.0, %v3716_v49  ;;  %v2205_v14 = vcombine.low %v1676_v40, %v1677_v38  ;;  %v1382_v23 = vadd.f32 %v2162_v51, %v3468_v63  ;;  %v2035_v8 = vsel %vm415_vm10, 1.0, %v3716_v49  ;;  %v3771_v38 = vld [vmem:[#allocation37_spill] sm:$0xff] }
 0x1b7   : > { %v1155_v25 = vadd.f32 %v2127_v16, %v1043_v59  ;;  %v1671_v32 = vadd.bf16 %v2238_v18, %v1599_v61  ;;  %v2230_v37 = vpack.c.bf16 %v2035_v8, %v2035_v8  ;;  %v1606_v9 = vadd.bf16 %v2229_v34, %v1534_v7  ;;  %v3776_v7 = vld [vmem:[#allocation8_spill] sm:$0xff] }
 0x1b8   : > { %v1096_v46 = vpop.permute.xlu1 %1095  ;;  %2291 = vmatprep.mubr.bf16.mxu1 %v2205_v14  ;;  %vm1329_vm11 = vcmp.eq.s32.totalorder %v2760_v43, %v3771_v38  ;;  %vm1338_vm0 = vcmp.eq.s32.totalorder %v2760_v43, %v3773_v56  ;;  %vm408_vm2 = vcmp.eq.s32.totalorder %v2760_v43, %v3774_v45  ;;  %vm417_vm8 = vcmp.eq.s32.totalorder %v2760_v43, %v3776_v7  ;;  %v1539_v7 = vld [vmem:[%s3400_s7 + $0x3c] sm:$0xf] }
 0x1b9   : > { %v3511_v44 = vadd.f32 %v2143_v19, %v1155_v25  ;;  %v1607_v21 = vadd.bf16 %v2230_v37, %v1535_v22  ;;  %v2157_v36 = vsel %vm1329_vm11, 1.0, %v3716_v49  ;;  %vm1114_vm13 = vcmp.eq.s32.totalorder %v2760_v43, %v1096_v46  ;;  %v3772_v25 = vld [vmem:[#allocation38_spill] sm:$0xff] }
 0x1ba   : > { %vm1330_vm14 = vcmp.eq.s32.totalorder %v2760_v43, %v3772_v25  ;;  %v2134_v41 = vsel %vm1114_vm13, 1.0, %v3716_v49  ;;  %v2028_v4 = vsel %vm408_vm2, 1.0, %v3716_v49 }
 0x1bb   : > { %v1162_v46 = vadd.f32 %v2134_v41, %v3490_v10  ;;  %v2223_v11 = vpack.c.bf16 %v2028_v4, %v2028_v4 }
 0x1bd   : > { %v1433_v50 = vpop.permute.xlu1 %1432 }
 0x1be   : > { %v1502_v30 = vmul.f32 %v1433_v50, %v1374_v12  ;;  %v1443_v50 = vpop.permute.xlu0 %1442 }
 0x1c0   : > { %v2237_v52 = vpack.c.bf16 %v1502_v30, %v1502_v30  ;;  %v1600_v30 = vadd.bf16 %v2223_v11, %v1528_v48 }
 0x1c1   : > { %v1473_v57 = vpop.permute.xlu1 %1472 }
 0x1c2   : > { %v1670_v5 = vadd.bf16 %v2237_v52, %v1598_v55  ;;  %v1510_v47 = vmul.f32 %v1473_v57, %v1382_v23  ;;  %v3775_v52 = vld [vmem:[#allocation4_spill] sm:$0xff]  ;;  %v1488_v57 = vpop.permute.xlu0 %1487 }
 0x1c3   : > { %vm409_vm5 = vcmp.eq.s32.totalorder %v2760_v43, %v3775_v52 }
 0x1c4   : > { %v2245_v20 = vpack.c.bf16 %v1510_v47, %v1510_v47  ;;  %v2202_v24 = vcombine.low %v1670_v5, %v1671_v32  ;;  %v3777_v5 = vld [vmem:[#allocation22_spill] sm:$0xff] }
 0x1c5   : > { %v1478_v29 = vpop.permute.xlu1 %1477  ;;  %vm416_vm9 = vcmp.eq.s32.totalorder %v2760_v43, %v3777_v5 }
 0x1c6   : > { %v1678_v42 = vadd.bf16 %v2245_v20, %v1606_v9  ;;  %v1511_v15 = vmul.f32 %v1478_v29, %v3770_v1  ;;  %2284 = vmatmul.mubr.bf16.vlgmr.msra.gmra.mrb[0].mxu0 %v2202_v24  ;;  %v3778_v20 = vld [vmem:[#allocation5_spill] sm:$0xff]  ;;  %v2037_v24 = vsel %vm417_vm8, 1.0, %v3716_v49  ;;  %v1529_v29 = vld [vmem:[%s3400_s7 + $0x14] sm:$0xf] }
 0x1c7   : > { %vm411_vm11 = vcmp.eq.s32.totalorder %v2760_v43, %v3778_v20  ;;  %v2232_v38 = vpack.c.bf16 %v2037_v24, %v2037_v24 }
 0x1c8   : > { %v2246_v2 = vpack.c.bf16 %v1511_v15, %v1511_v15  ;;  %v3779_v15 = vld [vmem:[#allocation43_spill] sm:$0xff] }
 0x1c9   : > { %vm410_vm13 = vcmp.eq.s32.totalorder %v2760_v43, %v3779_v15 }
 0x1ca   : > { %v1679_v63 = vadd.bf16 %v2246_v2, %v1607_v21  ;;  %v1181_v40 = vpop.permute.xlu1 %1180 }
 0x1cb   : > { %vm1217_vm12 = vcmp.eq.s32.totalorder %v2760_v43, %v1181_v40  ;;  %v2031_v40 = vsel %vm411_vm11, 1.0, %v3716_v49 }
 0x1cc   : > { %v2141_v27 = vsel %vm1217_vm12, 1.0, %v3716_v49  ;;  %v2206_v17 = vcombine.low %v1678_v42, %v1679_v63  ;;  %v2226_v45 = vpack.c.bf16 %v2031_v40, %v2031_v40 }
 0x1cd   : > { %v1265_v59 = vadd.f32 %v2141_v27, %v3424_v60  ;;  %v2158_v60 = vsel %vm1330_vm14, 1.0, %v3716_v49  ;;  %v1458_v27 = vpop.permute.xlu0 %1457 }
 0x1ce   : > { %v1202_v16 = vpop.permute.xlu1 %1201  ;;  %2292 = vmatmul.mubr.bf16.vlgmr.msra.gmra.mrb[0].mxu1 %v2206_v17 }
 0x1cf   : > { %v1377_v14 = vadd.f32 %v2157_v36, %v1265_v59  ;;  %vm1224_vm6 = vcmp.eq.s32.totalorder %v2760_v43, %v1202_v16  ;;  %v1537_v36 = vld [vmem:[%s3400_s7 + $0x34] sm:$0xf]  ;;  %v3780_v16 = vld [vmem:[#allocation9_spill] sm:$0xff] }
 0x1d0   : > { %v2148_v37 = vsel %vm1224_vm6, 1.0, %v3716_v49  ;;  %vm419_vm14 = vcmp.eq.s32.totalorder %v2760_v43, %v3780_v16 }
 0x1d1   : > { %v1272_v21 = vadd.f32 %v2148_v37, %v3470_v35  ;;  %v2030_v35 = vsel %vm410_vm13, 1.0, %v3716_v49 }
 0x1d2   : > { %v1184_v39 = vpop.permute.xlu1 %1183  ;;  %v2225_v4 = vpack.c.bf16 %v2030_v35, %v2030_v35 }
 0x1d3   : > { %vm1218_vm15 = vcmp.eq.s32.totalorder %v2760_v43, %v1184_v39 }
 0x1d4   : > { %v2142_v19 = vsel %vm1218_vm15, 1.0, %v3716_v49 }
 0x1d5   : > { %v1266_v28 = vadd.f32 %v2142_v19, %v3395_v54  ;;  %v2166_v54 = vsel %vm1338_vm0, 1.0, %v3716_v49  ;;  %v1536_v19 = vld [vmem:[%s3400_s7 + $0x30] sm:$0xf]  ;;  %vm1900_vm0 = vcmask 261120  }
 0x1d6   : > { %v1208_v33 = vpop.permute.xlu1 %1207 }
 0x1d7   : > { %vm1226_vm1 = vcmp.eq.s32.totalorder %v2760_v43, %v1208_v33  ;;  %v3549_v3 = vadd.f32 %v2158_v60, %v1266_v28 }
 0x1d8   : > { %v2150_v26 = vsel %vm1226_vm1, 1.0, %v3716_v49 }
 0x1d9   : > { %v1274_v53 = vadd.f32 %v2150_v26, %v1162_v46  ;;  %v1609_v26 = vadd.bf16 %v2232_v38, %v1537_v36 }
 0x1db   : > { %v1290_v6 = vpop.permute.xlu1 %1289  ;;  %v3556_v12 = vadd.f32 %v2166_v54, %v1274_v53  ;;  %v2039_v53 = vsel %vm419_vm14, 1.0, %v3716_v49  ;;  %v1531_v54 = vld [vmem:[%s3400_s7 + $0x1c] sm:$0xf] }
 0x1dc   : > { %vm1328_vm3 = vcmp.eq.s32.totalorder %v2760_v43, %v1290_v6  ;;  %v2234_v52 = vpack.c.bf16 %v2039_v53, %v2039_v53 }
 0x1dd   : > { %v2156_v10 = vsel %vm1328_vm3, 1.0, %v3716_v49 }
 0x1de   : > { %v1376_v31 = vadd.f32 %v2156_v10, %v3389_v13  ;;  %v2029_v13 = vsel %vm409_vm5, 1.0, %v3716_v49  ;;  %v1611_v37 = vadd.bf16 %v2234_v52, %v1539_v7 }
 0x1df   : > { %v1314_v62 = vpop.permute.xlu1 %1313  ;;  %v2224_v47 = vpack.c.bf16 %v2029_v13, %v2029_v13 }
 0x1e0   : > { %v1504_v18 = vmul.f32 %v1443_v50, %v1376_v31  ;;  %vm1336_vm10 = vcmp.eq.s32.totalorder %v2760_v43, %v1314_v62  ;;  %v1530_v31 = vld [vmem:[%s3400_s7 + $0x18] sm:$0xf] }
 0x1e1   : > { %v2164_v22 = vsel %vm1336_vm10, 1.0, %v3716_v49  ;;  %v1601_v59 = vadd.bf16 %v2224_v47, %v1529_v29 }
 0x1e2   : > { %v2239_v51 = vpack.c.bf16 %v1504_v18, %v1504_v18  ;;  %v1384_v41 = vadd.f32 %v2164_v22, %v1272_v21  ;;  %v2200_v22 = vld [vmem:[%s3658_s2] ss:$0 sm:$0xff] }
 0x1e3   : > { %v1317_v55 = vpop.permute.xlu1 %1316 }
 0x1e4   : > { %v3562_v34 = vadd.bf16 %v2239_v51, %v1600_v30  ;;  %vm1337_vm4 = vcmp.eq.s32.totalorder %v2760_v43, %v1317_v55 }
 0x1e5   : > { %v2165_v23 = vsel %vm1337_vm4, 1.0, %v3716_v49 }
 0x1e6   : > { %v1385_v32 = vadd.f32 %v2165_v23, %v3366_v58  ;;  %v2036_v58 = vsel %vm416_vm9, 1.0, %v3716_v49 }
 0x1e7   : > { %v1299_v61 = vpop.permute.xlu1 %1298  ;;  %v2231_v39 = vpack.c.bf16 %v2036_v58, %v2036_v58 }
 0x1e8   : > { %vm1331_vm7 = vcmp.eq.s32.totalorder %v2760_v43, %v1299_v61  ;;  %v1513_v42 = vmul.f32 %v1488_v57, %v1385_v32  ;;  %v1603_v61 = vadd.bf16 %v2226_v45, %v1531_v54 }
 0x1e9   : > { %v2159_v9 = vsel %vm1331_vm7, 1.0, %v3716_v49  ;;  %v1608_v6 = vadd.bf16 %v2231_v39, %v1536_v19 }
 0x1ea   : > { %v1379_v2 = vadd.f32 %v2159_v9, %v3511_v44  ;;  %v3781_v44 = vld [vmem:[#allocation12_spill] sm:$0xff] }
 0x1eb   : > { %v1323_v8 = vpop.permute.xlu1 %1322  ;;  %vm418_vm15 = vcmp.eq.s32.totalorder %v2760_v43, %v3781_v44 }
 0x1ec   : > { %vm1339_vm12 = vcmp.eq.s32.totalorder %v2760_v43, %v1323_v8  ;;  %v1507_v60 = vmul.f32 %v1458_v27, %v1379_v2  ;;  %v2038_v48 = vsel %vm418_vm15, 1.0, %v3716_v49  ;;  %v1538_v43 = vld [vmem:[%s3400_s7 + $0x38] sm:$0xf] }
 0x1ed   : > { %v2167_v17 = vsel %vm1339_vm12, 1.0, %v3716_v49  ;;  %v2233_v23 = vpack.c.bf16 %v2038_v48, %v2038_v48 }
 0x1ee   : > { %v1387_v33 = vadd.f32 %v2167_v17, %v3427_v0  ;;  %v1498_v0 = vpop.permute.xlu0 %1497  ;;  %v2242_v18 = vpack.c.bf16 %v1507_v60, %v1507_v60 }
 0x1ef   : > { %v1610_v9 = vadd.bf16 %v2233_v23, %v1538_v43 }
 0x1f0   : > { %v1448_v1 = vpop.permute.xlu1 %1447  ;;  %v1515_v30 = vmul.f32 %v1498_v0, %v1387_v33  ;;  %v1675_v47 = vadd.bf16 %v2242_v18, %v1603_v61 }
 0x1f1   : > { %v1505_v63 = vmul.f32 %v1448_v1, %v1377_v14  ;;  %v2248_v14 = vpack.c.bf16 %v1513_v42, %v1513_v42 }
 0x1f2   : > { %v2250_v49 = vpack.c.bf16 %v1515_v30, %v1515_v30 }
 0x1f3   : > { %v2240_v25 = vpack.c.bf16 %v1505_v63, %v1505_v63  ;;  %v1681_v62 = vadd.bf16 %v2248_v14, %v1609_v26 }
 0x1f4   : > { %v1483_v28 = vpop.permute.xlu1 %1482  ;;  %v1683_v29 = vadd.bf16 %v2250_v49, %v1611_v37 }
 0x1f5   : > { %v1673_v56 = vadd.bf16 %v2240_v25, %v1601_v59  ;;  %v1512_v46 = vmul.f32 %v1483_v28, %v1384_v41 }
 0x1f7   : > { %v2247_v10 = vpack.c.bf16 %v1512_v46, %v1512_v46  ;;  %v2203_v11 = vcombine.low %v3562_v34, %v1673_v56  ;;  %v1602_v34 = vadd.bf16 %v2225_v4, %v1530_v31 }
 0x1f8   : > { %v1453_v50 = vpop.permute.xlu1 %1452 }
 0x1f9   : > { %v1680_v51 = vadd.bf16 %v2247_v10, %v1608_v6  ;;  %v1506_v55 = vmul.f32 %v1453_v50, %v3549_v3  ;;  %2287 = vmatprep.mubr.bf16.mxu0 %v2203_v11 }
 0x1fb   : > { %v2241_v13 = vpack.c.bf16 %v1506_v55, %v1506_v55  ;;  %v2207_v8 = vcombine.low %v1680_v51, %v1681_v62 }
 0x1fc   : > { %v1493_v57 = vpop.permute.xlu1 %1492 }
 0x1fd   : > { %v1674_v32 = vadd.bf16 %v2241_v13, %v1602_v34  ;;  %v1514_v5 = vmul.f32 %v1493_v57, %v3556_v12  ;;  %2295 = vmatprep.mubr.bf16.mxu1 %v2207_v8 }
 0x1ff   : > { %v2249_v3 = vpack.c.bf16 %v1514_v5, %v1514_v5  ;;  %v2204_v20 = vcombine.low %v1674_v32, %v1675_v47 }
 0x201   : > { %v1682_v24 = vadd.bf16 %v2249_v3, %v1610_v9  ;;  %2288 = vmatmul.mubr.bf16.gmra.mrb[4].mxu0 %v2204_v20 }
 0x203   : > { %v2208_v58 = vcombine.low %v1682_v24, %v1683_v29 }
 0x205   : > { %2296 = vmatmul.mubr.bf16.gmra.mrb[4].mxu1 %v2208_v58 }
 0x299   : > { %v2285_v12 = vpop.f32.mrb[0].mxu0 }
 0x29a   : > { %v1846_v42 = vadd.f32 %v2285_v12, %v2200_v22  ;;  %v1837_v1 = vpop.f32.mrb[1].mxu0 }
 0x29b   : > { %v1838_v15 = vadd.f32 %v2200_v22, %v1837_v1  ;;  %v2286_v21 = vpop.f32.mrb[2].mxu0 }
 0x29c   : > { %1903 = vst.msk [vmem:[%s3619_s12 + $0x10] sm:$0xff] %vm1900_vm0, %v1846_v42  ;;  %v1849_v2 = vadd.f32 %v2286_v21, %v2200_v22  ;;  %v1840_v63 = vpop.f32.mrb[3].mxu0 }
 0x29d   : > { %1901 = vst.msk [vmem:[%s3619_s12] sm:$0xff] %vm1900_vm0, %v1838_v15  ;;  %v1841_v40 = vadd.f32 %v2200_v22, %v1840_v63 }
 0x29e   : > { %1904 = vst.msk [vmem:[%s3619_s12 + $0x18] sm:$0xff] %vm1900_vm0, %v1849_v2 }
 0x29f   : > { %1902 = vst.msk [vmem:[%s3619_s12 + $0x8] sm:$0xff] %vm1900_vm0, %v1841_v40 }
 0x2a1   : > { %v2293_v38 = vpop.f32.mrb[0].mxu1 }
 0x2a2   : > { %v1878_v27 = vadd.f32 %v2293_v38, %v2200_v22  ;;  %v1869_v17 = vpop.f32.mrb[1].mxu1 }
 0x2a3   : > { %v1870_v59 = vadd.f32 %v2200_v22, %v1869_v17  ;;  %v2294_v36 = vpop.f32.mrb[2].mxu1 }
 0x2a4   : > { %1911 = vst.msk [vmem:[%s3619_s12 + $0x50] sm:$0xff] %vm1900_vm0, %v1878_v27  ;;  %v1881_v16 = vadd.f32 %v2294_v36, %v2200_v22  ;;  %v1872_v39 = vpop.f32.mrb[3].mxu1 }
 0x2a5   : > { %1909 = vst.msk [vmem:[%s3619_s12 + $0x40] sm:$0xff] %vm1900_vm0, %v1870_v59  ;;  %v1873_v25 = vadd.f32 %v2200_v22, %v1872_v39 }
 0x2a6   : > { %1912 = vst.msk [vmem:[%s3619_s12 + $0x58] sm:$0xff] %vm1900_vm0, %v1881_v16 }
 0x2a7   : > { %1910 = vst.msk [vmem:[%s3619_s12 + $0x48] sm:$0xff] %vm1900_vm0, %v1873_v25 }
 0x2d4   : > { %v2289_v41 = vpop.f32.mrb[4].mxu0 }
 0x2d5   : > { %v1862_v35 = vadd.f32 %v2289_v41, %v2200_v22  ;;  %v1853_v19 = vpop.f32.mrb[5].mxu0 }
 0x2d6   : > { %v1854_v44 = vadd.f32 %v2200_v22, %v1853_v19  ;;  %v2290_v14 = vpop.f32.mrb[6].mxu0 }
 0x2d7   : > { %1907 = vst.msk [vmem:[%s3619_s12 + $0x30] sm:$0xff] %vm1900_vm0, %v1862_v35  ;;  %v1865_v28 = vadd.f32 %v2290_v14, %v2200_v22  ;;  %v1856_v60 = vpop.f32.mrb[7].mxu0 }
 0x2d8   : > { %1905 = vst.msk [vmem:[%s3619_s12 + $0x20] sm:$0xff] %vm1900_vm0, %v1854_v44  ;;  %v1857_v33 = vadd.f32 %v2200_v22, %v1856_v60  ;;  %v2297_v56 = vpop.f32.mrb[4].mxu1 }
 0x2d9   : > { %1908 = vst.msk [vmem:[%s3619_s12 + $0x38] sm:$0xff] %vm1900_vm0, %v1865_v28  ;;  %v1894_v46 = vadd.f32 %v2297_v56, %v2200_v22  ;;  %v1885_v45 = vpop.f32.mrb[5].mxu1 }
 0x2da   : > { %1906 = vst.msk [vmem:[%s3619_s12 + $0x28] sm:$0xff] %vm1900_vm0, %v1857_v33  ;;  %v1886_v26 = vadd.f32 %v2200_v22, %v1885_v45  ;;  %v2298_v53 = vpop.f32.mrb[6].mxu1 }
 0x2db   : > { %1915 = vst.msk [vmem:[%s3619_s12 + $0x70] sm:$0xff] %vm1900_vm0, %v1894_v46  ;;  %v1897_v54 = vadd.f32 %v2298_v53, %v2200_v22  ;;  %v1888_v4 = vpop.f32.mrb[7].mxu1 }
 0x2dc   : > { %1913 = vst.msk [vmem:[%s3619_s12 + $0x60] sm:$0xff] %vm1900_vm0, %v1886_v26  ;;  %v1889_v6 = vadd.f32 %v2200_v22, %v1888_v4 }
 0x2dd   : > { %1916 = vst.msk [vmem:[%s3619_s12 + $0x78] sm:$0xff] %vm1900_vm0, %v1897_v54 }
 0x2de   : > { %1914 = vst.msk [vmem:[%s3619_s12 + $0x68] sm:$0xff] %vm1900_vm0, %v1889_v6 }
 0x2df PF: > { %s16_s21 = sadd.s32 1, %s2402_s21  }
 0x2e0   : > { %p13_p4 = scmp.ge.s32.totalorder %s16_s21, 4  }
 0x2e2   :  { %15 = sbr.rel (!%p13_p4) target bundleno = 1 (0x1), region = 83 }

</bundles_post_ra>
